<compile_context>
chip_gen: v6e
topology: v6e:2x2x1
jax: 0.10.0
libtpu: 0.0.40
codegen_flags: <defaults>
</compile_context>

<pallas_src>
import math
import numpy as np
import jax
import jax.numpy as jnp
from jax.experimental import pallas as pl
from jax.experimental.pallas import tpu as pltpu

# ---------------- configuration (small, consistent with the module's forward) -------------
B = 2            # batch
N = 128          # points per batch element
HIDDEN = 32      # hidden_dim
Z_DIM = 32       # forward only typechecks when z_dim == hidden_dim (layer 1 is Linear(z_dim, hidden))
N_LAYERS = 8
SIGMAS = (0.15, 0.25, 0.15, 0.25, 0.15, 0.25, 0.15, 0.25)   # per GaussLayer in self.network
COLOR_SIGMA = 0.2
GRID_SCALE = 2.0 / 0.24                                     # UniformBoxWarp(0.24)

LANES = B * N          # batch fused into the lane dimension
TILE_L = LANES         # one tile at this toy size; use >=512 lanes per tile in production
K0 = 3 + Z_DIM         # layer-0 fused contraction dim  (coords + z)
KC = 3 + HIDDEN        # color-layer fused contraction dim (rays + h)
C_IN = 3 + Z_DIM + 3   # input slab rows: coords(3) + z(Z) + rays(3)

assert LANES % TILE_L == 0 and TILE_L % 128 == 0
assert Z_DIM == HIDDEN, "MLP_Gauss.forward requires z_dim == hidden_dim"


# ---------------- fused kernel ----------------
def mlp_gauss_kernel(x_ref, w0_ref, wsq_ref, wc_ref, wh_ref, bmain_ref, bhead_ref, out_ref):
    # x_ref     : (C_IN, TILE_L)  rows 0:3 coords^T, 3:3+Z z (lane-broadcast), last 3 rays^T
    # w0_ref    : (H, K0)         [W0_coord^T * GRID_SCALE | W0_z^T]
    # wsq_ref   : (7, H, H)       W1^T..W7^T
    # wc_ref    : (H, KC)         [Wc_ray^T | Wc_h^T]
    # wh_ref    : (4, H)          rows 0:3 = Wr^T, row 3 = Wf^T
    # bmain_ref : (9, H, TILE_L)  biases for layers 0..7 + color layer (pre-broadcast to lanes)
    # bhead_ref : (4, TILE_L)     rows 0:3 rgb bias, row 3 sigma bias (pre-broadcast)
    # out_ref   : (4, TILE_L)     rows 0:3 = rgb^T, row 3 = sigma^T   (lane-dense)

    def dot(a, b):
        return jnp.dot(a, b, preferred_element_type=jnp.float32)

    def gauss(x, sigma):
        c = -0.5 / (sigma * sigma)          # python float -> folded at trace time
        return jnp.exp(c * (x * x))

    x0 = x_ref[0:K0, :]                     # (K0, L)  coords + z  (box-warp folded into w0)
    rdT = x_ref[K0:C_IN, :]                 # (3, L)   ray directions

    # layer 0: one fused K=35 matmul
    h = gauss(dot(w0_ref[...], x0) + bmain_ref[0], SIGMAS[0])          # (H, L)

    # layers 1..7: one (H,H)@(H,L) push each, full-vreg bias add
    for i in range(1, N_LAYERS):
        h = gauss(dot(wsq_ref[i - 1], h) + bmain_ref[i], SIGMAS[i])

    # sigma head: Linear(H -> 1)
    sigmaT = dot(wh_ref[3:4, :], h) + bhead_ref[3:4, :]                # (1, L)

    # color head: GaussLayer(cat([rays, h])) as ONE fused K=35 matmul
    hc_in = jnp.concatenate([rdT, h], axis=0)                          # (KC, L)
    hc = gauss(dot(wc_ref[...], hc_in) + bmain_ref[8], COLOR_SIGMA)    # (H, L)
    rgbT = jax.nn.sigmoid(dot(wh_ref[0:3, :], hc) + bhead_ref[0:3, :]) # (3, L)

    # single lane-dense store
    out_ref[...] = jnp.concatenate([rgbT, sigmaT], axis=0)             # (4, L)


def forward(coords, z, rays, kp):
    # Layout plumbing only: channels -> sublanes, (batch, point) -> lanes.
    assert coords.shape == (B, N, 3) and z.shape == (B, Z_DIM) and rays.shape == (B, N, 3)
    L = LANES
    coordsT = jnp.transpose(coords, (2, 0, 1)).reshape(3, L)                       # (3, L)
    raysT = jnp.transpose(rays, (2, 0, 1)).reshape(3, L)                           # (3, L)
    z_b = jnp.broadcast_to(jnp.transpose(z)[:, :, None], (Z_DIM, B, N)).reshape(Z_DIM, L)
    x_in = jnp.concatenate([coordsT, z_b, raysT], axis=0)                          # (C_IN, L)

    grid = (L // TILE_L,)
    out = pl.pallas_call(
        mlp_gauss_kernel,
        out_shape=jax.ShapeDtypeStruct((4, L), jnp.float32),
        grid_spec=pltpu.PrefetchScalarGridSpec(
            num_scalar_prefetch=0,
            grid=grid,
            in_specs=[
                pl.BlockSpec((C_IN, TILE_L), lambda i: (0, i)),                    # point slab
                pl.BlockSpec((HIDDEN, K0), lambda i: (0, 0)),                      # w0 (resident)
                pl.BlockSpec((N_LAYERS - 1, HIDDEN, HIDDEN), lambda i: (0, 0, 0)), # w1..w7
                pl.BlockSpec((HIDDEN, KC), lambda i: (0, 0)),                      # color weight
                pl.BlockSpec((4, HIDDEN), lambda i: (0, 0)),                       # head weights
                pl.BlockSpec((N_LAYERS + 1, HIDDEN, TILE_L), lambda i: (0, 0, 0)), # main biases
                pl.BlockSpec((4, TILE_L), lambda i: (0, 0)),                       # head biases
            ],
            out_specs=pl.BlockSpec((4, TILE_L), lambda i: (0, i)),
        ),
        compiler_params=pltpu.CompilerParams(
            dimension_semantics=("parallel",)),   # shards lane tiles across v7x's 2 TCs
    )(x_in, kp["w0T"], kp["w_sq"], kp["wcT"], kp["w_head"], kp["b_main"], kp["b_head"])

    return jnp.transpose(out.reshape(4, B, N), (1, 2, 0))   # (B, N, 4) = [rgb, sigma]


# ---------------- deterministic parameter init (PyTorch nn.Linear default) ----------------
def _linear(key, fan_in, fan_out):
    kw, kb = jax.random.split(key)
    bound = 1.0 / math.sqrt(fan_in)
    W = jax.random.uniform(kw, (fan_in, fan_out), jnp.float32, -bound, bound)
    b = jax.random.uniform(kb, (fan_out,), jnp.float32, -bound, bound)
    return W, b


def init_params(key):
    keys = jax.random.split(key, N_LAYERS + 3)
    Ws, bs = [], []
    in_dims = [3 + Z_DIM, Z_DIM] + [HIDDEN] * (N_LAYERS - 2)
    for i in range(N_LAYERS):
        W, b = _linear(keys[i], in_dims[i], HIDDEN)
        Ws.append(W)
        bs.append(b)
    Wf, bf = _linear(keys[N_LAYERS], HIDDEN, 1)
    Wc, bc = _linear(keys[N_LAYERS + 1], HIDDEN + 3, HIDDEN)
    Wr, br = _linear(keys[N_LAYERS + 2], HIDDEN, 3)
    return dict(W=Ws, b=bs, Wf=Wf, bf=bf, Wc=Wc, bc=bc, Wr=Wr, br=br)


def pack_params(p):
    # Done ONCE outside the hot path.
    # layer 0: fold UniformBoxWarp scale into the coordinate rows, keep [coord | z] order.
    W0 = p["W"][0]                                                     # (3+Z, H)
    W0 = jnp.concatenate([W0[:3, :] * GRID_SCALE, W0[3:, :]], axis=0)
    w0T = jnp.transpose(W0)                                            # (H, K0)
    w_sq = jnp.stack([jnp.transpose(p["W"][i]) for i in range(1, N_LAYERS)], axis=0)  # (7,H,H)
    wcT = jnp.transpose(p["Wc"])                                       # (H, KC) order [rays | h]
    w_head = jnp.concatenate([jnp.transpose(p["Wr"]), jnp.transpose(p["Wf"])], axis=0)  # (4, H)
    # biases pre-broadcast to lane width -> plain full-vreg adds in the kernel
    b_main = jnp.stack(list(p["b"]) + [p["bc"]], axis=0)[:, :, None]   # (9, H, 1)
    b_main = jnp.broadcast_to(b_main, (N_LAYERS + 1, HIDDEN, TILE_L))
    b_head = jnp.broadcast_to(jnp.concatenate([p["br"], p["bf"]])[:, None], (4, TILE_L))
    return dict(w0T=w0T, w_sq=w_sq, wcT=wcT, w_head=w_head, b_main=b_main, b_head=b_head)


# ---------------- pure-JAX reference (mirrors the PyTorch forward exactly) ----------------
def gauss_act(x, sigma):
    return jnp.exp(-0.5 * jnp.square(x / sigma))


def reference_forward(coords, z, rays, p):
    x = coords * GRID_SCALE
    z_exp = jnp.broadcast_to(z[:, None, :], (B, N, Z_DIM))
    h = jnp.concatenate([x, z_exp], axis=-1)
    for i in range(N_LAYERS):
        h = gauss_act(h @ p["W"][i] + p["b"][i], SIGMAS[i])
    sigma = h @ p["Wf"] + p["bf"]
    hc = gauss_act(jnp.concatenate([rays, h], axis=-1) @ p["Wc"] + p["bc"], COLOR_SIGMA)
    rgb = jax.nn.sigmoid(hc @ p["Wr"] + p["br"])
    return jnp.concatenate([rgb, sigma], axis=-1)


if __name__ == "__main__":
    key = jax.random.PRNGKey(0)
    kparam, kc, kz, kr = jax.random.split(key, 4)
    ref_params = init_params(kparam)
    kernel_params = pack_params(ref_params)

    coords = jax.random.uniform(kc, (B, N, 3), jnp.float32, -0.12, 0.12)
    z = jax.random.normal(kz, (B, Z_DIM), jnp.float32)
    rays = jax.random.normal(kr, (B, N, 3), jnp.float32)
    rays = rays / jnp.linalg.norm(rays, axis=-1, keepdims=True)

    fwd = jax.jit(forward)
    out = jax.block_until_ready(fwd(coords, z, rays, kernel_params))

    ref = jax.block_until_ready(reference_forward(coords, z, rays, ref_params))
    assert out.shape == (B, N, 4)
    np.testing.assert_allclose(np.asarray(out), np.asarray(ref), rtol=1e-4, atol=1e-4)

    print("KERNEL_OK")
</pallas_src>

<mosaic_0001>
module attributes {stable_mosaic.version = 11 : i64} {
  func.func @mlp_gauss_kernel(%arg0: i32, %arg1: memref<38x256xf32, #tpu.memory_space<vmem>>, %arg2: memref<32x35xf32, #tpu.memory_space<vmem>>, %arg3: memref<7x32x32xf32, #tpu.memory_space<vmem>>, %arg4: memref<32x35xf32, #tpu.memory_space<vmem>>, %arg5: memref<4x32xf32, #tpu.memory_space<vmem>>, %arg6: memref<9x32x256xf32, #tpu.memory_space<vmem>>, %arg7: memref<4x256xf32, #tpu.memory_space<vmem>>, %arg8: memref<4x256xf32, #tpu.memory_space<vmem>>) attributes {dimension_semantics = [#tpu.dimension_semantics<parallel>], iteration_bounds = array<i64: 1>, scalar_prefetch = 0 : i64, scratch_operands = 0 : i64, tpu.core_type = #tpu.core_type<tc>, window_params = [{transform_indices = @transform_0, window_bounds = array<i64: 38, 256>}, {pipeline_mode = #tpu.pipeline_mode<synchronous>, transform_indices = @transform_1, window_bounds = array<i64: 32, 35>}, {pipeline_mode = #tpu.pipeline_mode<synchronous>, transform_indices = @transform_2, window_bounds = array<i64: 7, 32, 32>}, {pipeline_mode = #tpu.pipeline_mode<synchronous>, transform_indices = @transform_3, window_bounds = array<i64: 32, 35>}, {pipeline_mode = #tpu.pipeline_mode<synchronous>, transform_indices = @transform_4, window_bounds = array<i64: 4, 32>}, {pipeline_mode = #tpu.pipeline_mode<synchronous>, transform_indices = @transform_5, window_bounds = array<i64: 9, 32, 256>}, {pipeline_mode = #tpu.pipeline_mode<synchronous>, transform_indices = @transform_6, window_bounds = array<i64: 4, 256>}, {transform_indices = @transform_7, window_bounds = array<i64: 4, 256>}]} {
    %c0 = arith.constant 0 : index
    %c0_0 = arith.constant 0 : index
    %0 = vector.load %arg1[%c0, %c0_0] : memref<38x256xf32, #tpu.memory_space<vmem>>, vector<35x256xf32>
    %c35 = arith.constant 35 : index
    %c0_1 = arith.constant 0 : index
    %1 = vector.load %arg1[%c35, %c0_1] : memref<38x256xf32, #tpu.memory_space<vmem>>, vector<3x256xf32>
    %c0_2 = arith.constant 0 : index
    %c0_3 = arith.constant 0 : index
    %2 = vector.load %arg2[%c0_2, %c0_3] : memref<32x35xf32, #tpu.memory_space<vmem>>, vector<32x35xf32>
    %cst = arith.constant dense<0.000000e+00> : vector<32x256xf32>
    %3 = tpu.matmul %2, %0, %cst {dimension_numbers = #tpu.dot_dimension_numbers<[1], [0], [0], [1], [0, 0, 1, 1], [], []>} : vector<32x35xf32>, vector<35x256xf32>, vector<32x256xf32> -> vector<32x256xf32>
    %c0_4 = arith.constant 0 : index
    %c0_5 = arith.constant 0 : index
    %c0_6 = arith.constant 0 : index
    %4 = vector.load %arg6[%c0_4, %c0_5, %c0_6] : memref<9x32x256xf32, #tpu.memory_space<vmem>>, vector<1x32x256xf32>
    %5 = vector.shape_cast %4 : vector<1x32x256xf32> to vector<32x256xf32>
    %6 = arith.addf %3, %5 : vector<32x256xf32>
    %7 = arith.mulf %6, %6 : vector<32x256xf32>
    %cst_7 = arith.constant -22.2222214 : f32
    %8 = vector.broadcast %cst_7 : f32 to vector<32x256xf32>
    %9 = arith.mulf %8, %7 : vector<32x256xf32>
    %10 = math.exp %9 : vector<32x256xf32>
    %c0_8 = arith.constant 0 : index
    %c0_9 = arith.constant 0 : index
    %c0_10 = arith.constant 0 : index
    %11 = vector.load %arg3[%c0_8, %c0_9, %c0_10] : memref<7x32x32xf32, #tpu.memory_space<vmem>>, vector<1x32x32xf32>
    %12 = vector.shape_cast %11 : vector<1x32x32xf32> to vector<32x32xf32>
    %cst_11 = arith.constant dense<0.000000e+00> : vector<32x256xf32>
    %13 = tpu.matmul %12, %10, %cst_11 {dimension_numbers = #tpu.dot_dimension_numbers<[1], [0], [0], [1], [0, 0, 1, 1], [], []>} : vector<32x32xf32>, vector<32x256xf32>, vector<32x256xf32> -> vector<32x256xf32>
    %c1 = arith.constant 1 : index
    %c0_12 = arith.constant 0 : index
    %c0_13 = arith.constant 0 : index
    %14 = vector.load %arg6[%c1, %c0_12, %c0_13] : memref<9x32x256xf32, #tpu.memory_space<vmem>>, vector<1x32x256xf32>
    %15 = vector.shape_cast %14 : vector<1x32x256xf32> to vector<32x256xf32>
    %16 = arith.addf %13, %15 : vector<32x256xf32>
    %17 = arith.mulf %16, %16 : vector<32x256xf32>
    %cst_14 = arith.constant -8.000000e+00 : f32
    %18 = vector.broadcast %cst_14 : f32 to vector<32x256xf32>
    %19 = arith.mulf %18, %17 : vector<32x256xf32>
    %20 = math.exp %19 : vector<32x256xf32>
    %c1_15 = arith.constant 1 : index
    %c0_16 = arith.constant 0 : index
    %c0_17 = arith.constant 0 : index
    %21 = vector.load %arg3[%c1_15, %c0_16, %c0_17] : memref<7x32x32xf32, #tpu.memory_space<vmem>>, vector<1x32x32xf32>
    %22 = vector.shape_cast %21 : vector<1x32x32xf32> to vector<32x32xf32>
    %cst_18 = arith.constant dense<0.000000e+00> : vector<32x256xf32>
    %23 = tpu.matmul %22, %20, %cst_18 {dimension_numbers = #tpu.dot_dimension_numbers<[1], [0], [0], [1], [0, 0, 1, 1], [], []>} : vector<32x32xf32>, vector<32x256xf32>, vector<32x256xf32> -> vector<32x256xf32>
    %c2 = arith.constant 2 : index
    %c0_19 = arith.constant 0 : index
    %c0_20 = arith.constant 0 : index
    %24 = vector.load %arg6[%c2, %c0_19, %c0_20] : memref<9x32x256xf32, #tpu.memory_space<vmem>>, vector<1x32x256xf32>
    %25 = vector.shape_cast %24 : vector<1x32x256xf32> to vector<32x256xf32>
    %26 = arith.addf %23, %25 : vector<32x256xf32>
    %27 = arith.mulf %26, %26 : vector<32x256xf32>
    %cst_21 = arith.constant -22.2222214 : f32
    %28 = vector.broadcast %cst_21 : f32 to vector<32x256xf32>
    %29 = arith.mulf %28, %27 : vector<32x256xf32>
    %30 = math.exp %29 : vector<32x256xf32>
    %c2_22 = arith.constant 2 : index
    %c0_23 = arith.constant 0 : index
    %c0_24 = arith.constant 0 : index
    %31 = vector.load %arg3[%c2_22, %c0_23, %c0_24] : memref<7x32x32xf32, #tpu.memory_space<vmem>>, vector<1x32x32xf32>
    %32 = vector.shape_cast %31 : vector<1x32x32xf32> to vector<32x32xf32>
    %cst_25 = arith.constant dense<0.000000e+00> : vector<32x256xf32>
    %33 = tpu.matmul %32, %30, %cst_25 {dimension_numbers = #tpu.dot_dimension_numbers<[1], [0], [0], [1], [0, 0, 1, 1], [], []>} : vector<32x32xf32>, vector<32x256xf32>, vector<32x256xf32> -> vector<32x256xf32>
    %c3 = arith.constant 3 : index
    %c0_26 = arith.constant 0 : index
    %c0_27 = arith.constant 0 : index
    %34 = vector.load %arg6[%c3, %c0_26, %c0_27] : memref<9x32x256xf32, #tpu.memory_space<vmem>>, vector<1x32x256xf32>
    %35 = vector.shape_cast %34 : vector<1x32x256xf32> to vector<32x256xf32>
    %36 = arith.addf %33, %35 : vector<32x256xf32>
    %37 = arith.mulf %36, %36 : vector<32x256xf32>
    %cst_28 = arith.constant -8.000000e+00 : f32
    %38 = vector.broadcast %cst_28 : f32 to vector<32x256xf32>
    %39 = arith.mulf %38, %37 : vector<32x256xf32>
    %40 = math.exp %39 : vector<32x256xf32>
    %c3_29 = arith.constant 3 : index
    %c0_30 = arith.constant 0 : index
    %c0_31 = arith.constant 0 : index
    %41 = vector.load %arg3[%c3_29, %c0_30, %c0_31] : memref<7x32x32xf32, #tpu.memory_space<vmem>>, vector<1x32x32xf32>
    %42 = vector.shape_cast %41 : vector<1x32x32xf32> to vector<32x32xf32>
    %cst_32 = arith.constant dense<0.000000e+00> : vector<32x256xf32>
    %43 = tpu.matmul %42, %40, %cst_32 {dimension_numbers = #tpu.dot_dimension_numbers<[1], [0], [0], [1], [0, 0, 1, 1], [], []>} : vector<32x32xf32>, vector<32x256xf32>, vector<32x256xf32> -> vector<32x256xf32>
    %c4 = arith.constant 4 : index
    %c0_33 = arith.constant 0 : index
    %c0_34 = arith.constant 0 : index
    %44 = vector.load %arg6[%c4, %c0_33, %c0_34] : memref<9x32x256xf32, #tpu.memory_space<vmem>>, vector<1x32x256xf32>
    %45 = vector.shape_cast %44 : vector<1x32x256xf32> to vector<32x256xf32>
    %46 = arith.addf %43, %45 : vector<32x256xf32>
    %47 = arith.mulf %46, %46 : vector<32x256xf32>
    %cst_35 = arith.constant -22.2222214 : f32
    %48 = vector.broadcast %cst_35 : f32 to vector<32x256xf32>
    %49 = arith.mulf %48, %47 : vector<32x256xf32>
    %50 = math.exp %49 : vector<32x256xf32>
    %c4_36 = arith.constant 4 : index
    %c0_37 = arith.constant 0 : index
    %c0_38 = arith.constant 0 : index
    %51 = vector.load %arg3[%c4_36, %c0_37, %c0_38] : memref<7x32x32xf32, #tpu.memory_space<vmem>>, vector<1x32x32xf32>
    %52 = vector.shape_cast %51 : vector<1x32x32xf32> to vector<32x32xf32>
    %cst_39 = arith.constant dense<0.000000e+00> : vector<32x256xf32>
    %53 = tpu.matmul %52, %50, %cst_39 {dimension_numbers = #tpu.dot_dimension_numbers<[1], [0], [0], [1], [0, 0, 1, 1], [], []>} : vector<32x32xf32>, vector<32x256xf32>, vector<32x256xf32> -> vector<32x256xf32>
    %c5 = arith.constant 5 : index
    %c0_40 = arith.constant 0 : index
    %c0_41 = arith.constant 0 : index
    %54 = vector.load %arg6[%c5, %c0_40, %c0_41] : memref<9x32x256xf32, #tpu.memory_space<vmem>>, vector<1x32x256xf32>
    %55 = vector.shape_cast %54 : vector<1x32x256xf32> to vector<32x256xf32>
    %56 = arith.addf %53, %55 : vector<32x256xf32>
    %57 = arith.mulf %56, %56 : vector<32x256xf32>
    %cst_42 = arith.constant -8.000000e+00 : f32
    %58 = vector.broadcast %cst_42 : f32 to vector<32x256xf32>
    %59 = arith.mulf %58, %57 : vector<32x256xf32>
    %60 = math.exp %59 : vector<32x256xf32>
    %c5_43 = arith.constant 5 : index
    %c0_44 = arith.constant 0 : index
    %c0_45 = arith.constant 0 : index
    %61 = vector.load %arg3[%c5_43, %c0_44, %c0_45] : memref<7x32x32xf32, #tpu.memory_space<vmem>>, vector<1x32x32xf32>
    %62 = vector.shape_cast %61 : vector<1x32x32xf32> to vector<32x32xf32>
    %cst_46 = arith.constant dense<0.000000e+00> : vector<32x256xf32>
    %63 = tpu.matmul %62, %60, %cst_46 {dimension_numbers = #tpu.dot_dimension_numbers<[1], [0], [0], [1], [0, 0, 1, 1], [], []>} : vector<32x32xf32>, vector<32x256xf32>, vector<32x256xf32> -> vector<32x256xf32>
    %c6 = arith.constant 6 : index
    %c0_47 = arith.constant 0 : index
    %c0_48 = arith.constant 0 : index
    %64 = vector.load %arg6[%c6, %c0_47, %c0_48] : memref<9x32x256xf32, #tpu.memory_space<vmem>>, vector<1x32x256xf32>
    %65 = vector.shape_cast %64 : vector<1x32x256xf32> to vector<32x256xf32>
    %66 = arith.addf %63, %65 : vector<32x256xf32>
    %67 = arith.mulf %66, %66 : vector<32x256xf32>
    %cst_49 = arith.constant -22.2222214 : f32
    %68 = vector.broadcast %cst_49 : f32 to vector<32x256xf32>
    %69 = arith.mulf %68, %67 : vector<32x256xf32>
    %70 = math.exp %69 : vector<32x256xf32>
    %c6_50 = arith.constant 6 : index
    %c0_51 = arith.constant 0 : index
    %c0_52 = arith.constant 0 : index
    %71 = vector.load %arg3[%c6_50, %c0_51, %c0_52] : memref<7x32x32xf32, #tpu.memory_space<vmem>>, vector<1x32x32xf32>
    %72 = vector.shape_cast %71 : vector<1x32x32xf32> to vector<32x32xf32>
    %cst_53 = arith.constant dense<0.000000e+00> : vector<32x256xf32>
    %73 = tpu.matmul %72, %70, %cst_53 {dimension_numbers = #tpu.dot_dimension_numbers<[1], [0], [0], [1], [0, 0, 1, 1], [], []>} : vector<32x32xf32>, vector<32x256xf32>, vector<32x256xf32> -> vector<32x256xf32>
    %c7 = arith.constant 7 : index
    %c0_54 = arith.constant 0 : index
    %c0_55 = arith.constant 0 : index
    %74 = vector.load %arg6[%c7, %c0_54, %c0_55] : memref<9x32x256xf32, #tpu.memory_space<vmem>>, vector<1x32x256xf32>
    %75 = vector.shape_cast %74 : vector<1x32x256xf32> to vector<32x256xf32>
    %76 = arith.addf %73, %75 : vector<32x256xf32>
    %77 = arith.mulf %76, %76 : vector<32x256xf32>
    %cst_56 = arith.constant -8.000000e+00 : f32
    %78 = vector.broadcast %cst_56 : f32 to vector<32x256xf32>
    %79 = arith.mulf %78, %77 : vector<32x256xf32>
    %80 = math.exp %79 : vector<32x256xf32>
    %c3_57 = arith.constant 3 : index
    %c0_58 = arith.constant 0 : index
    %81 = vector.load %arg5[%c3_57, %c0_58] : memref<4x32xf32, #tpu.memory_space<vmem>>, vector<1x32xf32>
    %cst_59 = arith.constant dense<0.000000e+00> : vector<1x256xf32>
    %82 = tpu.matmul %81, %80, %cst_59 {dimension_numbers = #tpu.dot_dimension_numbers<[1], [0], [0], [1], [0, 0, 1, 1], [], []>} : vector<1x32xf32>, vector<32x256xf32>, vector<1x256xf32> -> vector<1x256xf32>
    %c3_60 = arith.constant 3 : index
    %c0_61 = arith.constant 0 : index
    %83 = vector.load %arg7[%c3_60, %c0_61] : memref<4x256xf32, #tpu.memory_space<vmem>>, vector<1x256xf32>
    %84 = arith.addf %82, %83 : vector<1x256xf32>
    %85 = tpu.concatenate %1, %80 in 0 : vector<3x256xf32>, vector<32x256xf32> -> vector<35x256xf32>
    %c0_62 = arith.constant 0 : index
    %c0_63 = arith.constant 0 : index
    %86 = vector.load %arg4[%c0_62, %c0_63] : memref<32x35xf32, #tpu.memory_space<vmem>>, vector<32x35xf32>
    %cst_64 = arith.constant dense<0.000000e+00> : vector<32x256xf32>
    %87 = tpu.matmul %86, %85, %cst_64 {dimension_numbers = #tpu.dot_dimension_numbers<[1], [0], [0], [1], [0, 0, 1, 1], [], []>} : vector<32x35xf32>, vector<35x256xf32>, vector<32x256xf32> -> vector<32x256xf32>
    %c8 = arith.constant 8 : index
    %c0_65 = arith.constant 0 : index
    %c0_66 = arith.constant 0 : index
    %88 = vector.load %arg6[%c8, %c0_65, %c0_66] : memref<9x32x256xf32, #tpu.memory_space<vmem>>, vector<1x32x256xf32>
    %89 = vector.shape_cast %88 : vector<1x32x256xf32> to vector<32x256xf32>
    %90 = arith.addf %87, %89 : vector<32x256xf32>
    %91 = arith.mulf %90, %90 : vector<32x256xf32>
    %cst_67 = arith.constant -1.250000e+01 : f32
    %92 = vector.broadcast %cst_67 : f32 to vector<32x256xf32>
    %93 = arith.mulf %92, %91 : vector<32x256xf32>
    %94 = math.exp %93 : vector<32x256xf32>
    %c0_68 = arith.constant 0 : index
    %c0_69 = arith.constant 0 : index
    %95 = vector.load %arg5[%c0_68, %c0_69] : memref<4x32xf32, #tpu.memory_space<vmem>>, vector<3x32xf32>
    %cst_70 = arith.constant dense<0.000000e+00> : vector<3x256xf32>
    %96 = tpu.matmul %95, %94, %cst_70 {dimension_numbers = #tpu.dot_dimension_numbers<[1], [0], [0], [1], [0, 0, 1, 1], [], []>} : vector<3x32xf32>, vector<32x256xf32>, vector<3x256xf32> -> vector<3x256xf32>
    %c0_71 = arith.constant 0 : index
    %c0_72 = arith.constant 0 : index
    %97 = vector.load %arg7[%c0_71, %c0_72] : memref<4x256xf32, #tpu.memory_space<vmem>>, vector<3x256xf32>
    %98 = arith.addf %96, %97 : vector<3x256xf32>
    %99 = arith.negf %98 : vector<3x256xf32>
    %100 = math.exp %99 : vector<3x256xf32>
    %cst_73 = arith.constant 1.000000e+00 : f32
    %101 = vector.broadcast %cst_73 : f32 to vector<3x256xf32>
    %102 = arith.addf %101, %100 : vector<3x256xf32>
    %103 = arith.divf %101, %102 : vector<3x256xf32>
    %104 = tpu.concatenate %103, %84 in 0 : vector<3x256xf32>, vector<1x256xf32> -> vector<4x256xf32>
    %c0_74 = arith.constant 0 : index
    %c0_75 = arith.constant 0 : index
    %105 = vector.load %arg8[%c0_74, %c0_75] : memref<4x256xf32, #tpu.memory_space<vmem>>, vector<4x256xf32>
    tpu.vector_store %arg8[%c0_74, %c0_75], %104 {strides = array<i32>} : memref<4x256xf32, #tpu.memory_space<vmem>>, vector<4x256xf32>,
    return
  }
  func.func @transform_0(%arg0: i32) -> (i32, i32) {
    %c0_i32 = arith.constant 0 : i32
    %c0_i32_0 = arith.constant 0 : i32
    return %c0_i32, %arg0 : i32, i32
  }
  func.func @transform_1(%arg0: i32) -> (i32, i32) {
    %c0_i32 = arith.constant 0 : i32
    %c0_i32_0 = arith.constant 0 : i32
    %c0_i32_1 = arith.constant 0 : i32
    return %c0_i32, %c0_i32_0 : i32, i32
  }
  func.func @transform_2(%arg0: i32) -> (i32, i32, i32) {
    %c0_i32 = arith.constant 0 : i32
    %c0_i32_0 = arith.constant 0 : i32
    %c0_i32_1 = arith.constant 0 : i32
    %c0_i32_2 = arith.constant 0 : i32
    return %c0_i32, %c0_i32_0, %c0_i32_1 : i32, i32, i32
  }
  func.func @transform_3(%arg0: i32) -> (i32, i32) {
    %c0_i32 = arith.constant 0 : i32
    %c0_i32_0 = arith.constant 0 : i32
    %c0_i32_1 = arith.constant 0 : i32
    return %c0_i32, %c0_i32_0 : i32, i32
  }
  func.func @transform_4(%arg0: i32) -> (i32, i32) {
    %c0_i32 = arith.constant 0 : i32
    %c0_i32_0 = arith.constant 0 : i32
    %c0_i32_1 = arith.constant 0 : i32
    return %c0_i32, %c0_i32_0 : i32, i32
  }
  func.func @transform_5(%arg0: i32) -> (i32, i32, i32) {
    %c0_i32 = arith.constant 0 : i32
    %c0_i32_0 = arith.constant 0 : i32
    %c0_i32_1 = arith.constant 0 : i32
    %c0_i32_2 = arith.constant 0 : i32
    return %c0_i32, %c0_i32_0, %c0_i32_1 : i32, i32, i32
  }
  func.func @transform_6(%arg0: i32) -> (i32, i32) {
    %c0_i32 = arith.constant 0 : i32
    %c0_i32_0 = arith.constant 0 : i32
    %c0_i32_1 = arith.constant 0 : i32
    return %c0_i32, %c0_i32_0 : i32, i32
  }
  func.func @transform_7(%arg0: i32) -> (i32, i32) {
    %c0_i32 = arith.constant 0 : i32
    %c0_i32_0 = arith.constant 0 : i32
    return %c0_i32, %arg0 : i32, i32
  }
}

</mosaic_0001>

<bundles_post_ra>
// kernel: forward.1
= control target key start
LH: loop header
LB: loop body
LE: loop exit
PB: predicated region body
PF: predicated region fallthrough
CT: control target
= control target key end

     0   :  { %12 = vsyncpa [#allocation3], 0  ;;  %s2198_s0 = inlined_call_operand.vmem [shape: f32[38,256], index: 0, kind: input, shape index: {}]   ;;  %s2199_s1 = inlined_call_operand.vmem [shape: f32[32,35], index: 1, kind: input, shape index: {}]   ;;  %s2200_s2 = inlined_call_operand.vmem [shape: f32[7,32,32], index: 2, kind: input, shape index: {}]   ;;  %s2201_s3 = inlined_call_operand.vmem [shape: f32[32,35], index: 3, kind: input, shape index: {}]   ;;  %s2202_s4 = inlined_call_operand.vmem [shape: f32[4,32], index: 4, kind: input, shape index: {}]   ;;  %s2203_s5 = inlined_call_operand.hbm [shape: f32[9,32,256], index: 5, kind: input, shape index: {}]   ;;  %s2204_s6 = inlined_call_operand.vmem [shape: f32[4,256], index: 6, kind: input, shape index: {}]   ;;  %s2205_s7 = inlined_call_operand.hbm [shape: f32[4,256], index: 7, kind: output, shape index: {}]  }
   0x1   :  { %13 = vsyncpa [#allocation4], 0  ;;  %s1901_s24 = smov [#allocation2]  }
   0x2   :  { %s29_s25 = sshll.u32 %s1901_s24, 4  ;;  %s30_s25 = int_to_ptr.vmem [resolvable:$true] %s29_s25 }
   0x3   :  { %s1865_s26 = scalar_lea.vmem %s30_s25, 9216  ;;  %p1870_p1 = scmp.lt.s32.totalorder %s30_s25, %s30_s25 }
   0x4   :  { %p1866_p0 = scmp.ne.s32.totalorder %s30_s25, %s1865_s26  ;;  %p1871_p2 = scmp.lt.s32.totalorder %s1865_s26, %s1865_s26 }
   0x6   :  { %p1872_p3 = por %p1871_p2, %p1870_p1 }
   0x8   :  { %p1873_p4 = pnand %p1872_p3, %p1866_p0 }
   0xa   :  { %1876 = shalt.err (!%p1873_p4)
}
   0xb   :  { %s1902_s27 = smov 256   ;;  %s1903_s28 = smov 16  }
   0xc   :  { %35 = dma.hbm_to_vmem [thread:$0]  %s2203_s5, 9216, %s30_s25, [#allocation3], %s1902_s27, %s1902_s27, %s1903_s28  }
   0xd   :  { %1897 = dma.done.wait [#allocation3], 9216  }
   0xe   :  { %1898 = vsyncadd [#allocation3], 4294958080  ;;  %v1904_v0 = vmov 0.0   ;;  %vm78_vm0 = vcmask 1042432   ;;  %v50_v1 = vld [vmem:[%s2198_s0 + $0x48] sm:$0x7] }
   0xf   :  { %149 = vmatprep.mubr.f32.mxu0 %v1904_v0  ;;  %296 = vmatprep.mubr.f32.mxu1 %v1904_v0  ;;  %v49_v2 = vld [vmem:[%s2198_s0 + $0x40] sm:$0x7]  ;;  %v48_v3 = vld [vmem:[%s2198_s0 + $0x38] sm:$0xff]  ;;  %v47_v4 = vld [vmem:[%s2198_s0 + $0x30] sm:$0xff]  ;;  %vm65_vm1 = vcmask 285696   ;;  %vm219_vm2 = vcmask 261120  }
  0x10   :  { %1630 = vmatprep.subr.msk.mxu0 %vm78_vm0, %v50_v1  ;;  %v46_v5 = vld [vmem:[%s2198_s0 + $0x28] sm:$0xff]  ;;  %v45_v6 = vld [vmem:[%s2198_s0 + $0x20] sm:$0xff]  ;;  %v44_v7 = vld [vmem:[%s2198_s0 + $0x18] sm:$0xff]  ;;  %s1905_s9 = smov [#allocation5]  }
  0x11   :  { %1631 = vmatpush1.msk.msra.mxu0 %vm78_vm0, %v49_v2  ;;  %v43_v8 = vld [vmem:[%s2198_s0 + $0x10] sm:$0xff]  ;;  %v42_v9 = vld [vmem:[%s2198_s0 + $0x8] sm:$0xff]  ;;  %v41_v10 = vld [vmem:[%s2198_s0] sm:$0xff]  ;;  %s1621_s10 = sshll.u32 %s1905_s9, 4  ;;  %s1622_s10 = int_to_ptr.vmem [resolvable:$true] %s1621_s10 }
  0x12   :  { %109 = vmatprep.subr.mxu0 %v48_v3  ;;  %v53_v11 = vld [vmem:[%s2199_s1] sm:$0xff]  ;;  %v54_v12 = vld [vmem:[%s2199_s1 + $0x8] sm:$0xff]  ;;  %v55_v13 = vld [vmem:[%s2199_s1 + $0x10] sm:$0xff]  ;;  %s1877_s11 = scalar_lea.vmem %s1622_s10, 128  ;;  %p1882_p6 = scmp.lt.s32.totalorder %s1622_s10, %s1622_s10 }
  0x13   :  { %110 = vmatpush1.msra.mxu0 %v47_v4  ;;  %v56_v14 = vld [vmem:[%s2199_s1 + $0x18] sm:$0xff]  ;;  %v61_v19 = vld [vmem:[#allocation2 + $0x20] sm:$0xff]  ;;  %v62_v22 = vld [vmem:[#allocation2 + $0x28] sm:$0xff]  ;;  %p1878_p5 = scmp.ne.s32.totalorder %s1622_s10, %s1877_s11  ;;  %p1883_p7 = scmp.lt.s32.totalorder %s1877_s11, %s1877_s11 }
  0x14   :  { %111 = vmatprep.subr.mxu0 %v46_v5  ;;  %v60_v20 = vld [vmem:[#allocation2 + $0x18] sm:$0xff]  ;;  %v59_v23 = vld [vmem:[#allocation2 + $0x10] sm:$0xff]  ;;  %v58_v24 = vld [vmem:[#allocation2 + $0x8] sm:$0xff] }
  0x15   :  { %112 = vmatpush1.msra.mxu0 %v45_v6  ;;  %v63_v27 = vld [vmem:[#allocation2 + $0x30] sm:$0xff]  ;;  %v57_v28 = vld [vmem:[#allocation2] sm:$0xff]  ;;  %v64_v33 = vld [vmem:[#allocation2 + $0x38] sm:$0xff]  ;;  %p1884_p8 = por %p1883_p7, %p1882_p6 }
  0x16   :  { %113 = vmatprep.subr.mxu0 %v44_v7  ;;  %v206_v7 = vld [vmem:[%s2200_s2] sm:$0xff] }
  0x17   :  { %114 = vmatpush1.msra.mxu0 %v43_v8  ;;  %p1885_p9 = pnand %p1884_p8, %p1878_p5 }
  0x18   :  { %115 = vmatprep.subr.mxu0 %v42_v9  ;;  %v207_v9 = vld [vmem:[%s2200_s2 + $0x8] sm:$0xff] }
  0x19   :  { %116 = vmatpush1.msra.mxu0 %v41_v10  ;;  %v208_v10 = vld [vmem:[%s2200_s2 + $0x10] sm:$0xff] }
  0x1a   :  { %1632 = vmatmul.mubr.msk.f32.vlgmr.msra.gmra.mxu0 %vm65_vm1, %v53_v11  ;;  %v209_v11 = vld [vmem:[%s2200_s2 + $0x18] sm:$0xff] }
  0x1b   :  { %155 = vmatprep.mubr.f32.mxu0 %v1904_v0 }
  0x1e   :  { %1633 = vmatmul.mubr.msk.f32.gmra.mxu0 %vm65_vm1, %v54_v12 }
  0x1f   :  { %161 = vmatprep.mubr.f32.mxu0 %v1904_v0 }
  0x22   :  { %1634 = vmatmul.mubr.msk.f32.gmra.mxu0 %vm65_vm1, %v55_v13 }
  0x23   :  { %167 = vmatprep.mubr.f32.mxu0 %v1904_v0 }
  0x26   :  { %1635 = vmatmul.mubr.msk.f32.gmra.mxu0 %vm65_vm1, %v56_v14 }
  0x27   :  { %590 = vmatprep.mubr.f32.mxu0 %v1904_v0 }
  0xda   :  { %v151_v15 = vpop.f32.mrf.mxu0 }
  0xdb   :  { %v152_v37 = vadd.f32 %v151_v15, %v57_v28 }
  0xdc   :  { %v153_v16 = vpop.f32.mrf.mxu0 }
  0xdd   :  { %v154_v34 = vadd.f32 %v153_v16, %v58_v24  ;;  %v174_v48 = vmul.f32 %v152_v37, %v152_v37  ;;  %v215_v16 = vld [vmem:[#allocation2 + $0x60] sm:$0xff]  ;;  %v217_v24 = vld [vmem:[#allocation2 + $0x70] sm:$0xff] }
  0xde   :  { %v157_v17 = vpop.f32.mrf.mxu0 }
  0xdf   :  { %v158_v31 = vadd.f32 %v157_v17, %v59_v23  ;;  %v175_v44 = vmul.f32 %v154_v34, %v154_v34  ;;  %v182_v57 = vmul.f32 -22.222221, %v174_v48  ;;  %v214_v17 = vld [vmem:[#allocation2 + $0x58] sm:$0xff] }
  0xe0   :  { %v159_v18 = vpop.f32.mrf.mxu0 }
  0xe1   :  { %v160_v29 = vadd.f32 %v159_v18, %v60_v20  ;;  %v176_v43 = vmul.f32 %v158_v31, %v158_v31  ;;  %v183_v54 = vmul.f32 -22.222221, %v175_v44  ;;  %v190_v62 = vmul.f32 1.442695, %v182_v57  ;;  %v213_v20 = vld [vmem:[#allocation2 + $0x50] sm:$0xff] }
  0xe2   :  { %v163_v21 = vpop.f32.mrf.mxu0 }
  0xe3   :  { %v164_v25 = vadd.f32 %v163_v21, %v61_v19  ;;  %v177_v40 = vmul.f32 %v160_v29, %v160_v29  ;;  %v184_v52 = vmul.f32 -22.222221, %v176_v43  ;;  %v192_v61 = vmul.f32 1.442695, %v183_v54  ;;  %v216_v19 = vld [vmem:[#allocation2 + $0x68] sm:$0xff] }
  0xe4   :  { %v165_v26 = vpop.f32.mrf.mxu0  ;;  %v212_v21 = vld [vmem:[#allocation2 + $0x48] sm:$0xff] }
  0xe5   :  { %v166_v30 = vadd.f32 %v165_v26, %v62_v22  ;;  %v178_v38 = vmul.f32 %v164_v25, %v164_v25  ;;  %v185_v50 = vmul.f32 -22.222221, %v177_v40  ;;  %v194_v60 = vmul.f32 1.442695, %v184_v52  ;;  %v211_v25 = vld [vmem:[#allocation2 + $0x40] sm:$0xff] }
  0xe6   :  { %v169_v32 = vpop.f32.mrf.mxu0 }
  0xe7   :  { %v179_v35 = vmul.f32 %v166_v30, %v166_v30  ;;  %v170_v36 = vadd.f32 %v169_v32, %v63_v27  ;;  %v186_v49 = vmul.f32 -22.222221, %v178_v38  ;;  %v196_v59 = vmul.f32 1.442695, %v185_v50  ;;  %v218_v30 = vld [vmem:[#allocation2 + $0x78] sm:$0xff] }
  0xe8   :  { %v171_v39 = vpop.f32.mrf.mxu0 }
  0xe9   :  { %v180_v41 = vmul.f32 %v170_v36, %v170_v36  ;;  %v172_v42 = vadd.f32 %v171_v39, %v64_v33  ;;  %v187_v45 = vmul.f32 -22.222221, %v179_v35  ;;  %v198_v58 = vmul.f32 1.442695, %v186_v49 }
  0xeb   :  { %v188_v46 = vmul.f32 -22.222221, %v180_v41  ;;  %v181_v47 = vmul.f32 %v172_v42, %v172_v42  ;;  %v200_v55 = vmul.f32 1.442695, %v187_v45 }
  0xed   :  { %v189_v51 = vmul.f32 -22.222221, %v181_v47  ;;  %v202_v53 = vmul.f32 1.442695, %v188_v46 }
  0xef   :  { %v204_v56 = vmul.f32 1.442695, %v189_v51 }
  0xf1   :  { %1705 = vpow2.f32 %v204_v56 }
  0xf2   :  { %1707 = vpow2.f32 %v202_v53 }
  0xf3   :  { %1709 = vpow2.f32 %v200_v55 }
  0xf4   :  { %1711 = vpow2.f32 %v198_v58 }
  0xf5   :  { %1713 = vpow2.f32 %v196_v59 }
  0xf6   :  { %1715 = vpow2.f32 %v194_v60 }
  0xf7   :  { %1717 = vpow2.f32 %v192_v61 }
  0xf8   :  { %1719 = vpow2.f32 %v190_v62 }
  0xfe   :  { %v1706_v63 = vpop.eup %1705 }
  0xff   :  { %v1708_v1 = vpop.eup %1707  ;;  %256 = vmatprep.subr.mxu1 %v1706_v63 }
 0x100   :  { %v1710_v2 = vpop.eup %1709  ;;  %257 = vmatpush1.msra.mxu1 %v1708_v1 }
 0x101   :  { %v1712_v3 = vpop.eup %1711  ;;  %258 = vmatprep.subr.mxu1 %v1710_v2 }
 0x102   :  { %v1714_v4 = vpop.eup %1713  ;;  %259 = vmatpush1.msra.mxu1 %v1712_v3 }
 0x103   :  { %v1716_v5 = vpop.eup %1715  ;;  %260 = vmatprep.subr.mxu1 %v1714_v4  ;;  %v1640_v4 = vld [vmem:[%s2200_s2 + $0x20] sm:$0xff] }
 0x104   :  { %v1718_v6 = vpop.eup %1717  ;;  %261 = vmatpush1.msra.mxu1 %v1716_v5 }
 0x105   :  { %v1720_v8 = vpop.eup %1719  ;;  %262 = vmatprep.subr.mxu1 %v1718_v6  ;;  %v1641_v6 = vld [vmem:[%s2200_s2 + $0x28] sm:$0xff] }
 0x106   :  { %263 = vmatpush1.msra.mxu1 %v1720_v8  ;;  %v1643_v8 = vld [vmem:[%s2200_s2 + $0x38] sm:$0xff] }
 0x107   :  { %1636 = vmatmul.mubr.msk.f32.vlgmr.msra.gmra.mxu1 %vm219_vm2, %v206_v7  ;;  %v1642_v7 = vld [vmem:[%s2200_s2 + $0x30] sm:$0xff] }
 0x108   :  { %302 = vmatprep.mubr.f32.mxu1 %v1904_v0 }
 0x10b   :  { %1637 = vmatmul.mubr.msk.f32.gmra.mxu1 %vm219_vm2, %v207_v9 }
 0x10c   :  { %308 = vmatprep.mubr.f32.mxu1 %v1904_v0 }
 0x10f   :  { %1638 = vmatmul.mubr.msk.f32.gmra.mxu1 %vm219_vm2, %v208_v10 }
 0x110   :  { %314 = vmatprep.mubr.f32.mxu1 %v1904_v0 }
 0x113   :  { %1639 = vmatmul.mubr.msk.f32.gmra.mxu1 %vm219_vm2, %v209_v11 }
 0x114   :  { %443 = vmatprep.mubr.f32.mxu1 %v1904_v0 }
 0x1c7   :  { %v298_v12 = vpop.f32.mrf.mxu1 }
 0x1c8   :  { %v299_v34 = vadd.f32 %v298_v12, %v211_v25 }
 0x1c9   :  { %v300_v13 = vpop.f32.mrf.mxu1 }
 0x1ca   :  { %v301_v31 = vadd.f32 %v300_v13, %v212_v21  ;;  %v321_v45 = vmul.f32 %v299_v34, %v299_v34  ;;  %v363_v13 = vld [vmem:[#allocation2 + $0xa0] sm:$0xff]  ;;  %v365_v21 = vld [vmem:[#allocation2 + $0xb0] sm:$0xff] }
 0x1cb   :  { %v304_v14 = vpop.f32.mrf.mxu1 }
 0x1cc   :  { %v305_v28 = vadd.f32 %v304_v14, %v213_v20  ;;  %v322_v41 = vmul.f32 %v301_v31, %v301_v31  ;;  %v329_v54 = vmul.f32 -8.0, %v321_v45  ;;  %v362_v14 = vld [vmem:[#allocation2 + $0x98] sm:$0xff] }
 0x1cd   :  { %v306_v15 = vpop.f32.mrf.mxu1 }
 0x1ce   :  { %v307_v26 = vadd.f32 %v306_v15, %v214_v17  ;;  %v323_v40 = vmul.f32 %v305_v28, %v305_v28  ;;  %v330_v51 = vmul.f32 -8.0, %v322_v41  ;;  %v337_v59 = vmul.f32 1.442695, %v329_v54  ;;  %v361_v17 = vld [vmem:[#allocation2 + $0x90] sm:$0xff] }
 0x1cf   :  { %v310_v18 = vpop.f32.mrf.mxu1 }
 0x1d0   :  { %v311_v22 = vadd.f32 %v310_v18, %v215_v16  ;;  %v324_v37 = vmul.f32 %v307_v26, %v307_v26  ;;  %v331_v49 = vmul.f32 -8.0, %v323_v40  ;;  %v339_v58 = vmul.f32 1.442695, %v330_v51  ;;  %v364_v16 = vld [vmem:[#allocation2 + $0xa8] sm:$0xff] }
 0x1d1   :  { %v312_v23 = vpop.f32.mrf.mxu1  ;;  %v360_v18 = vld [vmem:[#allocation2 + $0x88] sm:$0xff] }
 0x1d2   :  { %v313_v27 = vadd.f32 %v312_v23, %v216_v19  ;;  %v325_v35 = vmul.f32 %v311_v22, %v311_v22  ;;  %v332_v47 = vmul.f32 -8.0, %v324_v37  ;;  %v341_v57 = vmul.f32 1.442695, %v331_v49  ;;  %v359_v22 = vld [vmem:[#allocation2 + $0x80] sm:$0xff] }
 0x1d3   :  { %v316_v29 = vpop.f32.mrf.mxu1 }
 0x1d4   :  { %v326_v32 = vmul.f32 %v313_v27, %v313_v27  ;;  %v317_v33 = vadd.f32 %v316_v29, %v217_v24  ;;  %v333_v46 = vmul.f32 -8.0, %v325_v35  ;;  %v343_v56 = vmul.f32 1.442695, %v332_v47  ;;  %v366_v27 = vld [vmem:[#allocation2 + $0xb8] sm:$0xff] }
 0x1d5   :  { %v318_v36 = vpop.f32.mrf.mxu1 }
 0x1d6   :  { %v327_v38 = vmul.f32 %v317_v33, %v317_v33  ;;  %v319_v39 = vadd.f32 %v318_v36, %v218_v30  ;;  %v334_v42 = vmul.f32 -8.0, %v326_v32  ;;  %v345_v55 = vmul.f32 1.442695, %v333_v46 }
 0x1d8   :  { %v335_v43 = vmul.f32 -8.0, %v327_v38  ;;  %v328_v44 = vmul.f32 %v319_v39, %v319_v39  ;;  %v347_v52 = vmul.f32 1.442695, %v334_v42 }
 0x1da   :  { %v336_v48 = vmul.f32 -8.0, %v328_v44  ;;  %v349_v50 = vmul.f32 1.442695, %v335_v43 }
 0x1dc   :  { %v351_v53 = vmul.f32 1.442695, %v336_v48 }
 0x1de   :  { %1721 = vpow2.f32 %v351_v53 }
 0x1df   :  { %1723 = vpow2.f32 %v349_v50 }
 0x1e0   :  { %1725 = vpow2.f32 %v347_v52 }
 0x1e1   :  { %1727 = vpow2.f32 %v345_v55 }
 0x1e2   :  { %1729 = vpow2.f32 %v343_v56 }
 0x1e3   :  { %1731 = vpow2.f32 %v341_v57 }
 0x1e4   :  { %1733 = vpow2.f32 %v339_v58 }
 0x1e5   :  { %1735 = vpow2.f32 %v337_v59 }
 0x1eb   :  { %v1722_v60 = vpop.eup %1721 }
 0x1ec   :  { %v1724_v61 = vpop.eup %1723  ;;  %403 = vmatprep.subr.mxu1 %v1722_v60 }
 0x1ed   :  { %v1726_v62 = vpop.eup %1725  ;;  %404 = vmatpush1.msra.mxu1 %v1724_v61 }
 0x1ee   :  { %v1728_v63 = vpop.eup %1727  ;;  %405 = vmatprep.subr.mxu1 %v1726_v62 }
 0x1ef   :  { %v1730_v1 = vpop.eup %1729  ;;  %406 = vmatpush1.msra.mxu1 %v1728_v63 }
 0x1f0   :  { %v1732_v2 = vpop.eup %1731  ;;  %407 = vmatprep.subr.mxu1 %v1730_v1  ;;  %v1648_v1 = vld [vmem:[%s2200_s2 + $0x40] sm:$0xff] }
 0x1f1   :  { %v1734_v3 = vpop.eup %1733  ;;  %408 = vmatpush1.msra.mxu1 %v1732_v2 }
 0x1f2   :  { %v1736_v5 = vpop.eup %1735  ;;  %409 = vmatprep.subr.mxu1 %v1734_v3  ;;  %v1649_v3 = vld [vmem:[%s2200_s2 + $0x48] sm:$0xff] }
 0x1f3   :  { %410 = vmatpush1.msra.mxu1 %v1736_v5  ;;  %v1651_v5 = vld [vmem:[%s2200_s2 + $0x58] sm:$0xff] }
 0x1f4   :  { %1644 = vmatmul.mubr.msk.f32.vlgmr.msra.gmra.mxu1 %vm219_vm2, %v1640_v4  ;;  %v1650_v4 = vld [vmem:[%s2200_s2 + $0x50] sm:$0xff] }
 0x1f5   :  { %449 = vmatprep.mubr.f32.mxu1 %v1904_v0 }
 0x1f8   :  { %1645 = vmatmul.mubr.msk.f32.gmra.mxu1 %vm219_vm2, %v1641_v6 }
 0x1f9   :  { %455 = vmatprep.mubr.f32.mxu1 %v1904_v0 }
 0x1fc   :  { %1646 = vmatmul.mubr.msk.f32.gmra.mxu1 %vm219_vm2, %v1642_v7 }
 0x1fd   :  { %461 = vmatprep.mubr.f32.mxu1 %v1904_v0 }
 0x200   :  { %1647 = vmatmul.mubr.msk.f32.gmra.mxu1 %vm219_vm2, %v1643_v8 }
 0x201   :  { %737 = vmatprep.mubr.f32.mxu1 %v1904_v0 }
 0x2b4   :  { %v445_v9 = vpop.f32.mrf.mxu1 }
 0x2b5   :  { %v446_v31 = vadd.f32 %v445_v9, %v359_v22 }
 0x2b6   :  { %v447_v10 = vpop.f32.mrf.mxu1 }
 0x2b7   :  { %v448_v28 = vadd.f32 %v447_v10, %v360_v18  ;;  %v468_v42 = vmul.f32 %v446_v31, %v446_v31  ;;  %v510_v10 = vld [vmem:[#allocation2 + $0xe0] sm:$0xff]  ;;  %v512_v18 = vld [vmem:[#allocation2 + $0xf0] sm:$0xff] }
 0x2b8   :  { %v451_v11 = vpop.f32.mrf.mxu1 }
 0x2b9   :  { %v452_v25 = vadd.f32 %v451_v11, %v361_v17  ;;  %v469_v38 = vmul.f32 %v448_v28, %v448_v28  ;;  %v476_v51 = vmul.f32 -22.222221, %v468_v42  ;;  %v509_v11 = vld [vmem:[#allocation2 + $0xd8] sm:$0xff] }
 0x2ba   :  { %v453_v12 = vpop.f32.mrf.mxu1 }
 0x2bb   :  { %v454_v23 = vadd.f32 %v453_v12, %v362_v14  ;;  %v470_v37 = vmul.f32 %v452_v25, %v452_v25  ;;  %v477_v48 = vmul.f32 -22.222221, %v469_v38  ;;  %v484_v56 = vmul.f32 1.442695, %v476_v51  ;;  %v508_v14 = vld [vmem:[#allocation2 + $0xd0] sm:$0xff] }
 0x2bc   :  { %v457_v15 = vpop.f32.mrf.mxu1 }
 0x2bd   :  { %v458_v19 = vadd.f32 %v457_v15, %v363_v13  ;;  %v471_v34 = vmul.f32 %v454_v23, %v454_v23  ;;  %v478_v46 = vmul.f32 -22.222221, %v470_v37  ;;  %v486_v55 = vmul.f32 1.442695, %v477_v48  ;;  %v511_v13 = vld [vmem:[#allocation2 + $0xe8] sm:$0xff] }
 0x2be   :  { %v459_v20 = vpop.f32.mrf.mxu1  ;;  %v507_v15 = vld [vmem:[#allocation2 + $0xc8] sm:$0xff] }
 0x2bf   :  { %v460_v24 = vadd.f32 %v459_v20, %v364_v16  ;;  %v472_v32 = vmul.f32 %v458_v19, %v458_v19  ;;  %v479_v44 = vmul.f32 -22.222221, %v471_v34  ;;  %v488_v54 = vmul.f32 1.442695, %v478_v46  ;;  %v506_v19 = vld [vmem:[#allocation2 + $0xc0] sm:$0xff] }
 0x2c0   :  { %v463_v26 = vpop.f32.mrf.mxu1 }
 0x2c1   :  { %v473_v29 = vmul.f32 %v460_v24, %v460_v24  ;;  %v464_v30 = vadd.f32 %v463_v26, %v365_v21  ;;  %v480_v43 = vmul.f32 -22.222221, %v472_v32  ;;  %v490_v53 = vmul.f32 1.442695, %v479_v44  ;;  %v513_v24 = vld [vmem:[#allocation2 + $0xf8] sm:$0xff] }
 0x2c2   :  { %v465_v33 = vpop.f32.mrf.mxu1 }
 0x2c3   :  { %v474_v35 = vmul.f32 %v464_v30, %v464_v30  ;;  %v466_v36 = vadd.f32 %v465_v33, %v366_v27  ;;  %v481_v39 = vmul.f32 -22.222221, %v473_v29  ;;  %v492_v52 = vmul.f32 1.442695, %v480_v43 }
 0x2c5   :  { %v482_v40 = vmul.f32 -22.222221, %v474_v35  ;;  %v475_v41 = vmul.f32 %v466_v36, %v466_v36  ;;  %v494_v49 = vmul.f32 1.442695, %v481_v39 }
 0x2c7   :  { %v483_v45 = vmul.f32 -22.222221, %v475_v41  ;;  %v496_v47 = vmul.f32 1.442695, %v482_v40 }
 0x2c9   :  { %v498_v50 = vmul.f32 1.442695, %v483_v45 }
 0x2cb   :  { %1737 = vpow2.f32 %v498_v50 }
 0x2cc   :  { %1739 = vpow2.f32 %v496_v47 }
 0x2cd   :  { %1741 = vpow2.f32 %v494_v49 }
 0x2ce   :  { %1743 = vpow2.f32 %v492_v52 }
 0x2cf   :  { %1745 = vpow2.f32 %v490_v53 }
 0x2d0   :  { %1747 = vpow2.f32 %v488_v54 }
 0x2d1   :  { %1749 = vpow2.f32 %v486_v55 }
 0x2d2   :  { %1751 = vpow2.f32 %v484_v56 }
 0x2d8   :  { %v1738_v57 = vpop.eup %1737 }
 0x2d9   :  { %v1740_v58 = vpop.eup %1739  ;;  %550 = vmatprep.subr.mxu0 %v1738_v57 }
 0x2da   :  { %v1742_v59 = vpop.eup %1741  ;;  %551 = vmatpush1.msra.mxu0 %v1740_v58 }
 0x2db   :  { %v1744_v60 = vpop.eup %1743  ;;  %552 = vmatprep.subr.mxu0 %v1742_v59 }
 0x2dc   :  { %v1746_v61 = vpop.eup %1745  ;;  %553 = vmatpush1.msra.mxu0 %v1744_v60 }
 0x2dd   :  { %v1748_v62 = vpop.eup %1747  ;;  %554 = vmatprep.subr.mxu0 %v1746_v61  ;;  %v1656_v61 = vld [vmem:[%s2200_s2 + $0x60] sm:$0xff] }
 0x2de   :  { %v1750_v63 = vpop.eup %1749  ;;  %555 = vmatpush1.msra.mxu0 %v1748_v62 }
 0x2df   :  { %v1752_v2 = vpop.eup %1751  ;;  %556 = vmatprep.subr.mxu0 %v1750_v63  ;;  %v1657_v63 = vld [vmem:[%s2200_s2 + $0x68] sm:$0xff] }
 0x2e0   :  { %557 = vmatpush1.msra.mxu0 %v1752_v2  ;;  %v1659_v2 = vld [vmem:[%s2200_s2 + $0x78] sm:$0xff] }
 0x2e1   :  { %1652 = vmatmul.mubr.msk.f32.vlgmr.msra.gmra.mxu0 %vm219_vm2, %v1648_v1  ;;  %v1658_v1 = vld [vmem:[%s2200_s2 + $0x70] sm:$0xff] }
 0x2e2   :  { %596 = vmatprep.mubr.f32.mxu0 %v1904_v0 }
 0x2e5   :  { %1653 = vmatmul.mubr.msk.f32.gmra.mxu0 %vm219_vm2, %v1649_v3 }
 0x2e6   :  { %602 = vmatprep.mubr.f32.mxu0 %v1904_v0 }
 0x2e9   :  { %1654 = vmatmul.mubr.msk.f32.gmra.mxu0 %vm219_vm2, %v1650_v4 }
 0x2ea   :  { %608 = vmatprep.mubr.f32.mxu0 %v1904_v0 }
 0x2ed   :  { %1655 = vmatmul.mubr.msk.f32.gmra.mxu0 %vm219_vm2, %v1651_v5 }
 0x2ee   :  { %884 = vmatprep.mubr.f32.mxu0 %v1904_v0 }
 0x3a1   :  { %v592_v6 = vpop.f32.mrf.mxu0 }
 0x3a2   :  { %v593_v28 = vadd.f32 %v592_v6, %v506_v19 }
 0x3a3   :  { %v594_v7 = vpop.f32.mrf.mxu0 }
 0x3a4   :  { %v595_v25 = vadd.f32 %v594_v7, %v507_v15  ;;  %v615_v39 = vmul.f32 %v593_v28, %v593_v28  ;;  %v657_v7 = vld [vmem:[#allocation2 + $0x120] sm:$0xff]  ;;  %v659_v15 = vld [vmem:[#allocation2 + $0x130] sm:$0xff] }
 0x3a5   :  { %v598_v8 = vpop.f32.mrf.mxu0 }
 0x3a6   :  { %v599_v22 = vadd.f32 %v598_v8, %v508_v14  ;;  %v616_v35 = vmul.f32 %v595_v25, %v595_v25  ;;  %v623_v48 = vmul.f32 -8.0, %v615_v39  ;;  %v656_v8 = vld [vmem:[#allocation2 + $0x118] sm:$0xff] }
 0x3a7   :  { %v600_v9 = vpop.f32.mrf.mxu0 }
 0x3a8   :  { %v601_v20 = vadd.f32 %v600_v9, %v509_v11  ;;  %v617_v34 = vmul.f32 %v599_v22, %v599_v22  ;;  %v624_v45 = vmul.f32 -8.0, %v616_v35  ;;  %v631_v53 = vmul.f32 1.442695, %v623_v48  ;;  %v655_v11 = vld [vmem:[#allocation2 + $0x110] sm:$0xff] }
 0x3a9   :  { %v604_v12 = vpop.f32.mrf.mxu0 }
 0x3aa   :  { %v605_v16 = vadd.f32 %v604_v12, %v510_v10  ;;  %v618_v31 = vmul.f32 %v601_v20, %v601_v20  ;;  %v625_v43 = vmul.f32 -8.0, %v617_v34  ;;  %v633_v52 = vmul.f32 1.442695, %v624_v45  ;;  %v658_v10 = vld [vmem:[#allocation2 + $0x128] sm:$0xff] }
 0x3ab   :  { %v606_v17 = vpop.f32.mrf.mxu0  ;;  %v654_v12 = vld [vmem:[#allocation2 + $0x108] sm:$0xff] }
 0x3ac   :  { %v607_v21 = vadd.f32 %v606_v17, %v511_v13  ;;  %v619_v29 = vmul.f32 %v605_v16, %v605_v16  ;;  %v626_v41 = vmul.f32 -8.0, %v618_v31  ;;  %v635_v51 = vmul.f32 1.442695, %v625_v43  ;;  %v653_v16 = vld [vmem:[#allocation2 + $0x100] sm:$0xff] }
 0x3ad   :  { %v610_v23 = vpop.f32.mrf.mxu0 }
 0x3ae   :  { %v620_v26 = vmul.f32 %v607_v21, %v607_v21  ;;  %v611_v27 = vadd.f32 %v610_v23, %v512_v18  ;;  %v627_v40 = vmul.f32 -8.0, %v619_v29  ;;  %v637_v50 = vmul.f32 1.442695, %v626_v41  ;;  %v660_v21 = vld [vmem:[#allocation2 + $0x138] sm:$0xff] }
 0x3af   :  { %v612_v30 = vpop.f32.mrf.mxu0 }
 0x3b0   :  { %v621_v32 = vmul.f32 %v611_v27, %v611_v27  ;;  %v613_v33 = vadd.f32 %v612_v30, %v513_v24  ;;  %v628_v36 = vmul.f32 -8.0, %v620_v26  ;;  %v639_v49 = vmul.f32 1.442695, %v627_v40 }
 0x3b2   :  { %v629_v37 = vmul.f32 -8.0, %v621_v32  ;;  %v622_v38 = vmul.f32 %v613_v33, %v613_v33  ;;  %v641_v46 = vmul.f32 1.442695, %v628_v36 }
 0x3b4   :  { %v630_v42 = vmul.f32 -8.0, %v622_v38  ;;  %v643_v44 = vmul.f32 1.442695, %v629_v37 }
 0x3b6   :  { %v645_v47 = vmul.f32 1.442695, %v630_v42 }
 0x3b8   :  { %1753 = vpow2.f32 %v645_v47 }
 0x3b9   :  { %1755 = vpow2.f32 %v643_v44 }
 0x3ba   :  { %1757 = vpow2.f32 %v641_v46 }
 0x3bb   :  { %1759 = vpow2.f32 %v639_v49 }
 0x3bc   :  { %1761 = vpow2.f32 %v637_v50 }
 0x3bd   :  { %1763 = vpow2.f32 %v635_v51 }
 0x3be   :  { %1765 = vpow2.f32 %v633_v52 }
 0x3bf   :  { %1767 = vpow2.f32 %v631_v53 }
 0x3c5   :  { %v1754_v54 = vpop.eup %1753 }
 0x3c6   :  { %v1756_v55 = vpop.eup %1755  ;;  %697 = vmatprep.subr.mxu1 %v1754_v54 }
 0x3c7   :  { %v1758_v56 = vpop.eup %1757  ;;  %698 = vmatpush1.msra.mxu1 %v1756_v55 }
 0x3c8   :  { %v1760_v57 = vpop.eup %1759  ;;  %699 = vmatprep.subr.mxu1 %v1758_v56 }
 0x3c9   :  { %v1762_v58 = vpop.eup %1761  ;;  %700 = vmatpush1.msra.mxu1 %v1760_v57 }
 0x3ca   :  { %v1764_v59 = vpop.eup %1763  ;;  %701 = vmatprep.subr.mxu1 %v1762_v58  ;;  %v1664_v58 = vld [vmem:[%s2200_s2 + $0x80] sm:$0xff] }
 0x3cb   :  { %v1766_v60 = vpop.eup %1765  ;;  %702 = vmatpush1.msra.mxu1 %v1764_v59 }
 0x3cc   :  { %v1768_v62 = vpop.eup %1767  ;;  %703 = vmatprep.subr.mxu1 %v1766_v60  ;;  %v1665_v60 = vld [vmem:[%s2200_s2 + $0x88] sm:$0xff] }
 0x3cd   :  { %704 = vmatpush1.msra.mxu1 %v1768_v62  ;;  %v1667_v62 = vld [vmem:[%s2200_s2 + $0x98] sm:$0xff] }
 0x3ce   :  { %1660 = vmatmul.mubr.msk.f32.vlgmr.msra.gmra.mxu1 %vm219_vm2, %v1656_v61  ;;  %v1666_v61 = vld [vmem:[%s2200_s2 + $0x90] sm:$0xff] }
 0x3cf   :  { %743 = vmatprep.mubr.f32.mxu1 %v1904_v0 }
 0x3d2   :  { %1661 = vmatmul.mubr.msk.f32.gmra.mxu1 %vm219_vm2, %v1657_v63 }
 0x3d3   :  { %749 = vmatprep.mubr.f32.mxu1 %v1904_v0 }
 0x3d6   :  { %1662 = vmatmul.mubr.msk.f32.gmra.mxu1 %vm219_vm2, %v1658_v1 }
 0x3d7   :  { %755 = vmatprep.mubr.f32.mxu1 %v1904_v0 }
 0x3da   :  { %1663 = vmatmul.mubr.msk.f32.gmra.mxu1 %vm219_vm2, %v1659_v2 }
 0x3db   :  { %1031 = vmatprep.mubr.f32.mxu1 %v1904_v0 }
 0x48e   :  { %v739_v3 = vpop.f32.mrf.mxu1 }
 0x48f   :  { %v740_v25 = vadd.f32 %v739_v3, %v653_v16 }
 0x490   :  { %v741_v4 = vpop.f32.mrf.mxu1 }
 0x491   :  { %v742_v22 = vadd.f32 %v741_v4, %v654_v12  ;;  %v762_v36 = vmul.f32 %v740_v25, %v740_v25  ;;  %v804_v4 = vld [vmem:[#allocation2 + $0x160] sm:$0xff]  ;;  %v806_v12 = vld [vmem:[#allocation2 + $0x170] sm:$0xff] }
 0x492   :  { %v745_v5 = vpop.f32.mrf.mxu1 }
 0x493   :  { %v746_v19 = vadd.f32 %v745_v5, %v655_v11  ;;  %v763_v32 = vmul.f32 %v742_v22, %v742_v22  ;;  %v770_v45 = vmul.f32 -22.222221, %v762_v36  ;;  %v803_v5 = vld [vmem:[#allocation2 + $0x158] sm:$0xff] }
 0x494   :  { %v747_v6 = vpop.f32.mrf.mxu1 }
 0x495   :  { %v748_v17 = vadd.f32 %v747_v6, %v656_v8  ;;  %v764_v31 = vmul.f32 %v746_v19, %v746_v19  ;;  %v771_v42 = vmul.f32 -22.222221, %v763_v32  ;;  %v778_v50 = vmul.f32 1.442695, %v770_v45  ;;  %v802_v8 = vld [vmem:[#allocation2 + $0x150] sm:$0xff] }
 0x496   :  { %v751_v9 = vpop.f32.mrf.mxu1 }
 0x497   :  { %v752_v13 = vadd.f32 %v751_v9, %v657_v7  ;;  %v765_v28 = vmul.f32 %v748_v17, %v748_v17  ;;  %v772_v40 = vmul.f32 -22.222221, %v764_v31  ;;  %v780_v49 = vmul.f32 1.442695, %v771_v42  ;;  %v805_v7 = vld [vmem:[#allocation2 + $0x168] sm:$0xff] }
 0x498   :  { %v753_v14 = vpop.f32.mrf.mxu1  ;;  %v801_v9 = vld [vmem:[#allocation2 + $0x148] sm:$0xff] }
 0x499   :  { %v754_v18 = vadd.f32 %v753_v14, %v658_v10  ;;  %v766_v26 = vmul.f32 %v752_v13, %v752_v13  ;;  %v773_v38 = vmul.f32 -22.222221, %v765_v28  ;;  %v782_v48 = vmul.f32 1.442695, %v772_v40  ;;  %v800_v13 = vld [vmem:[#allocation2 + $0x140] sm:$0xff] }
 0x49a   :  { %v757_v20 = vpop.f32.mrf.mxu1 }
 0x49b   :  { %v767_v23 = vmul.f32 %v754_v18, %v754_v18  ;;  %v758_v24 = vadd.f32 %v757_v20, %v659_v15  ;;  %v774_v37 = vmul.f32 -22.222221, %v766_v26  ;;  %v784_v47 = vmul.f32 1.442695, %v773_v38  ;;  %v807_v18 = vld [vmem:[#allocation2 + $0x178] sm:$0xff] }
 0x49c   :  { %v759_v27 = vpop.f32.mrf.mxu1 }
 0x49d   :  { %v768_v29 = vmul.f32 %v758_v24, %v758_v24  ;;  %v760_v30 = vadd.f32 %v759_v27, %v660_v21  ;;  %v775_v33 = vmul.f32 -22.222221, %v767_v23  ;;  %v786_v46 = vmul.f32 1.442695, %v774_v37 }
 0x49f   :  { %v776_v34 = vmul.f32 -22.222221, %v768_v29  ;;  %v769_v35 = vmul.f32 %v760_v30, %v760_v30  ;;  %v788_v43 = vmul.f32 1.442695, %v775_v33 }
 0x4a1   :  { %v777_v39 = vmul.f32 -22.222221, %v769_v35  ;;  %v790_v41 = vmul.f32 1.442695, %v776_v34 }
 0x4a3   :  { %v792_v44 = vmul.f32 1.442695, %v777_v39 }
 0x4a5   :  { %1769 = vpow2.f32 %v792_v44 }
 0x4a6   :  { %1771 = vpow2.f32 %v790_v41 }
 0x4a7   :  { %1773 = vpow2.f32 %v788_v43 }
 0x4a8   :  { %1775 = vpow2.f32 %v786_v46 }
 0x4a9   :  { %1777 = vpow2.f32 %v784_v47 }
 0x4aa   :  { %1779 = vpow2.f32 %v782_v48 }
 0x4ab   :  { %1781 = vpow2.f32 %v780_v49 }
 0x4ac   :  { %1783 = vpow2.f32 %v778_v50 }
 0x4b2   :  { %v1770_v51 = vpop.eup %1769 }
 0x4b3   :  { %v1772_v52 = vpop.eup %1771  ;;  %844 = vmatprep.subr.mxu0 %v1770_v51 }
 0x4b4   :  { %v1774_v53 = vpop.eup %1773  ;;  %845 = vmatpush1.msra.mxu0 %v1772_v52 }
 0x4b5   :  { %v1776_v54 = vpop.eup %1775  ;;  %846 = vmatprep.subr.mxu0 %v1774_v53 }
 0x4b6   :  { %v1778_v55 = vpop.eup %1777  ;;  %847 = vmatpush1.msra.mxu0 %v1776_v54 }
 0x4b7   :  { %v1780_v56 = vpop.eup %1779  ;;  %848 = vmatprep.subr.mxu0 %v1778_v55  ;;  %v1672_v55 = vld [vmem:[%s2200_s2 + $0xa0] sm:$0xff] }
 0x4b8   :  { %v1782_v57 = vpop.eup %1781  ;;  %849 = vmatpush1.msra.mxu0 %v1780_v56 }
 0x4b9   :  { %v1784_v59 = vpop.eup %1783  ;;  %850 = vmatprep.subr.mxu0 %v1782_v57  ;;  %v1673_v57 = vld [vmem:[%s2200_s2 + $0xa8] sm:$0xff] }
 0x4ba   :  { %851 = vmatpush1.msra.mxu0 %v1784_v59  ;;  %v1675_v59 = vld [vmem:[%s2200_s2 + $0xb8] sm:$0xff] }
 0x4bb   :  { %1668 = vmatmul.mubr.msk.f32.vlgmr.msra.gmra.mxu0 %vm219_vm2, %v1664_v58  ;;  %v1674_v58 = vld [vmem:[%s2200_s2 + $0xb0] sm:$0xff] }
 0x4bc   :  { %890 = vmatprep.mubr.f32.mxu0 %v1904_v0 }
 0x4bf   :  { %1669 = vmatmul.mubr.msk.f32.gmra.mxu0 %vm219_vm2, %v1665_v60 }
 0x4c0   :  { %896 = vmatprep.mubr.f32.mxu0 %v1904_v0 }
 0x4c3   :  { %1670 = vmatmul.mubr.msk.f32.gmra.mxu0 %vm219_vm2, %v1666_v61 }
 0x4c4   :  { %902 = vmatprep.mubr.f32.mxu0 %v1904_v0 }
 0x4c7   :  { %1671 = vmatmul.mubr.msk.f32.gmra.mxu0 %vm219_vm2, %v1667_v62 }
 0x4c8   :  { %1178 = vmatprep.mubr.f32.mxu0 %v1904_v0 }
 0x57b   :  { %v886_v63 = vpop.f32.mrf.mxu0 }
 0x57c   :  { %v887_v22 = vadd.f32 %v886_v63, %v800_v13 }
 0x57d   :  { %v888_v1 = vpop.f32.mrf.mxu0 }
 0x57e   :  { %v889_v19 = vadd.f32 %v888_v1, %v801_v9  ;;  %v909_v33 = vmul.f32 %v887_v22, %v887_v22  ;;  %v951_v1 = vld [vmem:[#allocation2 + $0x1a0] sm:$0xff]  ;;  %v953_v9 = vld [vmem:[#allocation2 + $0x1b0] sm:$0xff] }
 0x57f   :  { %v892_v2 = vpop.f32.mrf.mxu0 }
 0x580   :  { %v893_v16 = vadd.f32 %v892_v2, %v802_v8  ;;  %v910_v29 = vmul.f32 %v889_v19, %v889_v19  ;;  %v917_v42 = vmul.f32 -8.0, %v909_v33  ;;  %v950_v2 = vld [vmem:[#allocation2 + $0x198] sm:$0xff] }
 0x581   :  { %v894_v3 = vpop.f32.mrf.mxu0 }
 0x582   :  { %v895_v14 = vadd.f32 %v894_v3, %v803_v5  ;;  %v911_v28 = vmul.f32 %v893_v16, %v893_v16  ;;  %v918_v39 = vmul.f32 -8.0, %v910_v29  ;;  %v925_v47 = vmul.f32 1.442695, %v917_v42  ;;  %v949_v5 = vld [vmem:[#allocation2 + $0x190] sm:$0xff] }
 0x583   :  { %v898_v6 = vpop.f32.mrf.mxu0 }
 0x584   :  { %v899_v10 = vadd.f32 %v898_v6, %v804_v4  ;;  %v912_v25 = vmul.f32 %v895_v14, %v895_v14  ;;  %v919_v37 = vmul.f32 -8.0, %v911_v28  ;;  %v927_v46 = vmul.f32 1.442695, %v918_v39  ;;  %v952_v4 = vld [vmem:[#allocation2 + $0x1a8] sm:$0xff] }
 0x585   :  { %v900_v11 = vpop.f32.mrf.mxu0  ;;  %v948_v6 = vld [vmem:[#allocation2 + $0x188] sm:$0xff] }
 0x586   :  { %v901_v15 = vadd.f32 %v900_v11, %v805_v7  ;;  %v913_v23 = vmul.f32 %v899_v10, %v899_v10  ;;  %v920_v35 = vmul.f32 -8.0, %v912_v25  ;;  %v929_v45 = vmul.f32 1.442695, %v919_v37  ;;  %v947_v10 = vld [vmem:[#allocation2 + $0x180] sm:$0xff] }
 0x587   :  { %v904_v17 = vpop.f32.mrf.mxu0 }
 0x588   :  { %v914_v20 = vmul.f32 %v901_v15, %v901_v15  ;;  %v905_v21 = vadd.f32 %v904_v17, %v806_v12  ;;  %v921_v34 = vmul.f32 -8.0, %v913_v23  ;;  %v931_v44 = vmul.f32 1.442695, %v920_v35  ;;  %v954_v15 = vld [vmem:[#allocation2 + $0x1b8] sm:$0xff] }
 0x589   :  { %v906_v24 = vpop.f32.mrf.mxu0 }
 0x58a   :  { %v915_v26 = vmul.f32 %v905_v21, %v905_v21  ;;  %v907_v27 = vadd.f32 %v906_v24, %v807_v18  ;;  %v922_v30 = vmul.f32 -8.0, %v914_v20  ;;  %v933_v43 = vmul.f32 1.442695, %v921_v34 }
 0x58c   :  { %v923_v31 = vmul.f32 -8.0, %v915_v26  ;;  %v916_v32 = vmul.f32 %v907_v27, %v907_v27  ;;  %v935_v40 = vmul.f32 1.442695, %v922_v30 }
 0x58e   :  { %v924_v36 = vmul.f32 -8.0, %v916_v32  ;;  %v937_v38 = vmul.f32 1.442695, %v923_v31 }
 0x590   :  { %v939_v41 = vmul.f32 1.442695, %v924_v36 }
 0x592   :  { %1785 = vpow2.f32 %v939_v41 }
 0x593   :  { %1787 = vpow2.f32 %v937_v38 }
 0x594   :  { %1789 = vpow2.f32 %v935_v40 }
 0x595   :  { %1791 = vpow2.f32 %v933_v43 }
 0x596   :  { %1793 = vpow2.f32 %v931_v44 }
 0x597   :  { %1795 = vpow2.f32 %v929_v45 }
 0x598   :  { %1797 = vpow2.f32 %v927_v46 }
 0x599   :  { %1799 = vpow2.f32 %v925_v47 }
 0x59f   :  { %v1786_v48 = vpop.eup %1785 }
 0x5a0   :  { %v1788_v49 = vpop.eup %1787  ;;  %991 = vmatprep.subr.mxu1 %v1786_v48 }
 0x5a1   :  { %v1790_v50 = vpop.eup %1789  ;;  %992 = vmatpush1.msra.mxu1 %v1788_v49 }
 0x5a2   :  { %v1792_v51 = vpop.eup %1791  ;;  %993 = vmatprep.subr.mxu1 %v1790_v50 }
 0x5a3   :  { %v1794_v52 = vpop.eup %1793  ;;  %994 = vmatpush1.msra.mxu1 %v1792_v51 }
 0x5a4   :  { %v1796_v53 = vpop.eup %1795  ;;  %995 = vmatprep.subr.mxu1 %v1794_v52  ;;  %v1680_v52 = vld [vmem:[%s2200_s2 + $0xc0] sm:$0xff] }
 0x5a5   :  { %v1798_v54 = vpop.eup %1797  ;;  %996 = vmatpush1.msra.mxu1 %v1796_v53 }
 0x5a6   :  { %v1800_v56 = vpop.eup %1799  ;;  %997 = vmatprep.subr.mxu1 %v1798_v54  ;;  %v1681_v54 = vld [vmem:[%s2200_s2 + $0xc8] sm:$0xff] }
 0x5a7   :  { %998 = vmatpush1.msra.mxu1 %v1800_v56  ;;  %v1683_v56 = vld [vmem:[%s2200_s2 + $0xd8] sm:$0xff] }
 0x5a8   :  { %1676 = vmatmul.mubr.msk.f32.vlgmr.msra.gmra.mxu1 %vm219_vm2, %v1672_v55  ;;  %v1682_v55 = vld [vmem:[%s2200_s2 + $0xd0] sm:$0xff] }
 0x5a9   :  { %1037 = vmatprep.mubr.f32.mxu1 %v1904_v0 }
 0x5ac   :  { %1677 = vmatmul.mubr.msk.f32.gmra.mxu1 %vm219_vm2, %v1673_v57 }
 0x5ad   :  { %1043 = vmatprep.mubr.f32.mxu1 %v1904_v0 }
 0x5b0   :  { %1678 = vmatmul.mubr.msk.f32.gmra.mxu1 %vm219_vm2, %v1674_v58 }
 0x5b1   :  { %1049 = vmatprep.mubr.f32.mxu1 %v1904_v0 }
 0x5b4   :  { %1679 = vmatmul.mubr.msk.f32.gmra.mxu1 %vm219_vm2, %v1675_v59 }
 0x5b5   :  { %1316 = vmatprep.mubr.f32.mxu1 %v1904_v0 }
 0x668   :  { %v1033_v60 = vpop.f32.mrf.mxu1 }
 0x669   :  { %v1034_v19 = vadd.f32 %v1033_v60, %v947_v10  ;;  %v1097_v60 = vld [vmem:[#allocation2 + $0x1d8] sm:$0xff]  ;;  %v1100_v10 = vld [vmem:[#allocation2 + $0x1f0] sm:$0xff] }
 0x66a   :  { %v1035_v61 = vpop.f32.mrf.mxu1 }
 0x66b   :  { %v1036_v16 = vadd.f32 %v1035_v61, %v948_v6  ;;  %v1056_v30 = vmul.f32 %v1034_v19, %v1034_v19  ;;  %v1096_v61 = vld [vmem:[#allocation2 + $0x1d0] sm:$0xff] }
 0x66c   :  { %v1039_v62 = vpop.f32.mrf.mxu1 }
 0x66d   :  { %v1040_v13 = vadd.f32 %v1039_v62, %v949_v5  ;;  %v1057_v26 = vmul.f32 %v1036_v16, %v1036_v16  ;;  %v1064_v39 = vmul.f32 -22.222221, %v1056_v30  ;;  %v1099_v5 = vld [vmem:[#allocation2 + $0x1e8] sm:$0xff]  ;;  %v1101_v16 = vld [vmem:[#allocation2 + $0x1f8] sm:$0xff] }
 0x66e   :  { %v1041_v63 = vpop.f32.mrf.mxu1 }
 0x66f   :  { %v1042_v11 = vadd.f32 %v1041_v63, %v950_v2  ;;  %v1058_v25 = vmul.f32 %v1040_v13, %v1040_v13  ;;  %v1065_v36 = vmul.f32 -22.222221, %v1057_v26  ;;  %v1072_v44 = vmul.f32 1.442695, %v1064_v39  ;;  %v1095_v63 = vld [vmem:[#allocation2 + $0x1c8] sm:$0xff]  ;;  %v1094_v2 = vld [vmem:[#allocation2 + $0x1c0] sm:$0xff] }
 0x670   :  { %v1045_v3 = vpop.f32.mrf.mxu1 }
 0x671   :  { %v1046_v7 = vadd.f32 %v1045_v3, %v951_v1  ;;  %v1059_v22 = vmul.f32 %v1042_v11, %v1042_v11  ;;  %v1066_v34 = vmul.f32 -22.222221, %v1058_v25  ;;  %v1074_v43 = vmul.f32 1.442695, %v1065_v36  ;;  %v1098_v1 = vld [vmem:[#allocation2 + $0x1e0] sm:$0xff] }
 0x672   :  { %v1047_v8 = vpop.f32.mrf.mxu1 }
 0x673   :  { %v1048_v12 = vadd.f32 %v1047_v8, %v952_v4  ;;  %v1060_v20 = vmul.f32 %v1046_v7, %v1046_v7  ;;  %v1067_v32 = vmul.f32 -22.222221, %v1059_v22  ;;  %v1076_v42 = vmul.f32 1.442695, %v1066_v34 }
 0x674   :  { %v1051_v14 = vpop.f32.mrf.mxu1 }
 0x675   :  { %v1061_v17 = vmul.f32 %v1048_v12, %v1048_v12  ;;  %v1052_v18 = vadd.f32 %v1051_v14, %v953_v9  ;;  %v1068_v31 = vmul.f32 -22.222221, %v1060_v20  ;;  %v1078_v41 = vmul.f32 1.442695, %v1067_v32 }
 0x676   :  { %v1053_v21 = vpop.f32.mrf.mxu1 }
 0x677   :  { %v1062_v23 = vmul.f32 %v1052_v18, %v1052_v18  ;;  %v1054_v24 = vadd.f32 %v1053_v21, %v954_v15  ;;  %v1069_v27 = vmul.f32 -22.222221, %v1061_v17  ;;  %v1080_v40 = vmul.f32 1.442695, %v1068_v31 }
 0x679   :  { %v1070_v28 = vmul.f32 -22.222221, %v1062_v23  ;;  %v1063_v29 = vmul.f32 %v1054_v24, %v1054_v24  ;;  %v1082_v37 = vmul.f32 1.442695, %v1069_v27 }
 0x67b   :  { %v1071_v33 = vmul.f32 -22.222221, %v1063_v29  ;;  %v1084_v35 = vmul.f32 1.442695, %v1070_v28 }
 0x67d   :  { %v1086_v38 = vmul.f32 1.442695, %v1071_v33 }
 0x67f   :  { %1801 = vpow2.f32 %v1086_v38 }
 0x680   :  { %1803 = vpow2.f32 %v1084_v35 }
 0x681   :  { %1805 = vpow2.f32 %v1082_v37 }
 0x682   :  { %1807 = vpow2.f32 %v1080_v40 }
 0x683   :  { %1809 = vpow2.f32 %v1078_v41 }
 0x684   :  { %1811 = vpow2.f32 %v1076_v42 }
 0x685   :  { %1813 = vpow2.f32 %v1074_v43 }
 0x686   :  { %1815 = vpow2.f32 %v1072_v44 }
 0x68c   :  { %v1802_v45 = vpop.eup %1801 }
 0x68d   :  { %v1804_v46 = vpop.eup %1803  ;;  %1138 = vmatprep.subr.mxu0 %v1802_v45 }
 0x68e   :  { %v1806_v47 = vpop.eup %1805  ;;  %1139 = vmatpush1.msra.mxu0 %v1804_v46 }
 0x68f   :  { %v1808_v48 = vpop.eup %1807  ;;  %1140 = vmatprep.subr.mxu0 %v1806_v47 }
 0x690   :  { %v1810_v49 = vpop.eup %1809  ;;  %1141 = vmatpush1.msra.mxu0 %v1808_v48 }
 0x691   :  { %v1812_v50 = vpop.eup %1811  ;;  %1142 = vmatprep.subr.mxu0 %v1810_v49 }
 0x692   :  { %v1814_v51 = vpop.eup %1813  ;;  %1143 = vmatpush1.msra.mxu0 %v1812_v50 }
 0x693   :  { %v1816_v53 = vpop.eup %1815  ;;  %1144 = vmatprep.subr.mxu0 %v1814_v51 }
 0x694   :  { %1145 = vmatpush1.msra.mxu0 %v1816_v53 }
 0x695   :  { %1684 = vmatmul.mubr.msk.f32.vlgmr.msra.gmra.mxu0 %vm219_vm2, %v1680_v52 }
 0x696   :  { %1184 = vmatprep.mubr.f32.mxu0 %v1904_v0 }
 0x699   :  { %1685 = vmatmul.mubr.msk.f32.gmra.mxu0 %vm219_vm2, %v1681_v54  ;;  %v52_v54 = vld [vmem:[%s2198_s0 + $0x48] sm:$0x38] }
 0x69a   :  { %1190 = vmatprep.mubr.f32.mxu0 %v1904_v0 }
 0x69d   :  { %1686 = vmatmul.mubr.msk.f32.gmra.mxu0 %vm219_vm2, %v1682_v55 }
 0x69e   :  { %1196 = vmatprep.mubr.f32.mxu0 %v1904_v0 }
 0x6a1   :  { %1687 = vmatmul.mubr.msk.f32.gmra.mxu0 %vm219_vm2, %v1683_v56 }
 0x6a2   :  { %1454 = vmatprep.mubr.f32.mxu0 %v1904_v0 }
 0x755   :  { %v1180_v57 = vpop.f32.mrf.mxu0 }
 0x756   :  { %v1181_v11 = vadd.f32 %v1180_v57, %v1094_v2  ;;  %v51_v57 = vld [vmem:[%s2198_s0 + $0x40] sm:$0x38] }
 0x757   :  { %v1182_v58 = vpop.f32.mrf.mxu0  ;;  %v1325_v2 = vrot.slane %v51_v57, 3 }
 0x758   :  { %v1183_v7 = vadd.f32 %v1182_v58, %v1095_v63  ;;  %v1203_v23 = vmul.f32 %v1181_v11, %v1181_v11  ;;  %v1235_v11 = vld [vmem:[%s2202_s4 + $0x3] sm:$0x1] }
 0x759   :  { %v1186_v59 = vpop.f32.mrf.mxu0 }
 0x75a   :  { %v1187_v6 = vadd.f32 %v1186_v59, %v1096_v61  ;;  %v1204_v20 = vmul.f32 %v1183_v7, %v1183_v7  ;;  %v1211_v34 = vmul.f32 -8.0, %v1203_v23 }
 0x75b   :  { %v1188_v62 = vpop.f32.mrf.mxu0 }
 0x75c   :  { %v1189_v3 = vadd.f32 %v1188_v62, %v1097_v60  ;;  %v1205_v17 = vmul.f32 %v1187_v6, %v1187_v6  ;;  %v1212_v32 = vmul.f32 -8.0, %v1204_v20  ;;  %v1219_v41 = vmul.f32 1.442695, %v1211_v34  ;;  %v1361_v6 = vld [vmem:[%s2201_s3] sm:$0xff]  ;;  %v1368_v20 = vld [vmem:[#allocation2 + $0x210] sm:$0xff] }
 0x75d   :  { %v1192_v4 = vpop.f32.mrf.mxu0  ;;  %v1326_v62 = vrot.slane %v52_v54, 3 }
 0x75e   :  { %v1193_v8 = vadd.f32 %v1192_v4, %v1098_v1  ;;  %v1206_v13 = vmul.f32 %v1189_v3, %v1189_v3  ;;  %v1213_v28 = vmul.f32 -8.0, %v1205_v17  ;;  %v1221_v40 = vmul.f32 1.442695, %v1212_v32  ;;  %v1369_v17 = vld [vmem:[#allocation2 + $0x218] sm:$0xff] }
 0x75f   :  { %v1194_v9 = vpop.f32.mrf.mxu0 }
 0x760   :  { %v1195_v12 = vadd.f32 %v1194_v9, %v1099_v5  ;;  %v1207_v14 = vmul.f32 %v1193_v8, %v1193_v8  ;;  %v1214_v27 = vmul.f32 -8.0, %v1206_v13  ;;  %v1223_v38 = vmul.f32 1.442695, %v1213_v28  ;;  %v1362_v8 = vld [vmem:[%s2201_s3 + $0x8] sm:$0xff]  ;;  %v1363_v9 = vld [vmem:[%s2201_s3 + $0x10] sm:$0xff] }
 0x761   :  { %v1198_v15 = vpop.f32.mrf.mxu0 }
 0x762   :  { %v1208_v18 = vmul.f32 %v1195_v12, %v1195_v12  ;;  %v1199_v19 = vadd.f32 %v1198_v15, %v1100_v10  ;;  %v1215_v21 = vmul.f32 -8.0, %v1207_v14  ;;  %v1225_v37 = vmul.f32 1.442695, %v1214_v27  ;;  %v1364_v10 = vld [vmem:[%s2201_s3 + $0x18] sm:$0xff] }
 0x763   :  { %v1200_v22 = vpop.f32.mrf.mxu0 }
 0x764   :  { %v1216_v24 = vmul.f32 -8.0, %v1208_v18  ;;  %v1209_v25 = vmul.f32 %v1199_v19, %v1199_v19  ;;  %v1201_v26 = vadd.f32 %v1200_v22, %v1101_v16  ;;  %v1227_v33 = vmul.f32 1.442695, %v1215_v21  ;;  %v1370_v16 = vld [vmem:[#allocation2 + $0x220] sm:$0xff]  ;;  %v1371_v19 = vld [vmem:[#allocation2 + $0x228] sm:$0xff] }
 0x765   :  { %v1367_v21 = vld [vmem:[#allocation2 + $0x208] sm:$0xff] }
 0x766   :  { %v1229_v29 = vmul.f32 1.442695, %v1216_v24  ;;  %v1217_v30 = vmul.f32 -8.0, %v1209_v25  ;;  %v1210_v31 = vmul.f32 %v1201_v26, %v1201_v26  ;;  %v1372_v24 = vld [vmem:[#allocation2 + $0x230] sm:$0xff]  ;;  %v1366_v25 = vld [vmem:[#allocation2 + $0x200] sm:$0xff] }
 0x768   :  { %v1231_v35 = vmul.f32 1.442695, %v1217_v30  ;;  %v1218_v36 = vmul.f32 -8.0, %v1210_v31  ;;  %1817 = vpow2.f32 %v1229_v29  ;;  %v1373_v30 = vld [vmem:[#allocation2 + $0x238] sm:$0xff] }
 0x76a   :  { %1819 = vpow2.f32 %v1231_v35  ;;  %v1233_v39 = vmul.f32 1.442695, %v1218_v36 }
 0x76b   :  { %1821 = vpow2.f32 %v1227_v33 }
 0x76c   :  { %1823 = vpow2.f32 %v1233_v39 }
 0x76d   :  { %1825 = vpow2.f32 %v1225_v37 }
 0x76e   :  { %1827 = vpow2.f32 %v1223_v38 }
 0x76f   :  { %1829 = vpow2.f32 %v1221_v40 }
 0x770   :  { %1831 = vpow2.f32 %v1219_v41 }
 0x775   :  { %v1818_v42 = vpop.eup %1817 }
 0x776   :  { %v1345_v49 = vrot.slane %v1818_v42, 5 }
 0x777   :  { %v1820_v43 = vpop.eup %1819 }
 0x778   :  { %v1822_v44 = vpop.eup %1821  ;;  %v1347_v48 = vrot.slane %v1820_v43, 5 }
 0x779   :  { %v1824_v45 = vpop.eup %1823  ;;  %v1343_v53 = vrot.slane %v1822_v44, 5 }
 0x77a   :  { %v1826_v46 = vpop.eup %1825  ;;  %1276 = vmatprep.subr.mxu1 %v1824_v45  ;;  %v1349_v47 = vrot.slane %v1824_v45, 5 }
 0x77b   :  { %v1828_v50 = vpop.eup %1827  ;;  %1277 = vmatpush1.msra.mxu1 %v1820_v43  ;;  %v1341_v56 = vrot.slane %v1826_v46, 5  ;;  %v1348_v58 = vsel %vm78_vm0, %v1343_v53, %v1347_v48 }
 0x77c   :  { %v1830_v51 = vpop.eup %1829  ;;  %1278 = vmatprep.subr.mxu1 %v1818_v42  ;;  %1690 = vmatprep.subr.msk.mxu0 %vm78_vm0, %v1349_v47  ;;  %v1350_v52 = vsel %vm78_vm0, %v1345_v49, %v1349_v47  ;;  %v1339_v59 = vrot.slane %v1828_v50, 5 }
 0x77d   :  { %v1832_v55 = vpop.eup %1831  ;;  %1279 = vmatpush1.msra.mxu1 %v1822_v44  ;;  %1691 = vmatpush1.msk.msra.mxu0 %vm78_vm0, %v1347_v48  ;;  %v1346_v60 = vsel %vm78_vm0, %v1341_v56, %v1345_v49  ;;  %v1338_v61 = vrot.slane %v1830_v51, 5 }
 0x77e   :  { %1280 = vmatprep.subr.mxu1 %v1826_v46  ;;  %1414 = vmatprep.subr.mxu0 %v1350_v52  ;;  %v1344_v63 = vsel %vm78_vm0, %v1339_v59, %v1343_v53  ;;  %v1337_v1 = vrot.slane %v1832_v55, 5 }
 0x77f   :  { %1281 = vmatpush1.msra.mxu1 %v1828_v50  ;;  %1415 = vmatpush1.msra.mxu0 %v1348_v58  ;;  %v1342_v3 = vsel %vm78_vm0, %v1338_v61, %v1341_v56  ;;  %v1360_v5 = vsel %vm78_vm0, %v1326_v62, %v1338_v61 }
 0x780   :  { %1282 = vmatprep.subr.mxu1 %v1830_v51  ;;  %1416 = vmatprep.subr.mxu0 %v1346_v60  ;;  %v1340_v4 = vsel %vm78_vm0, %v1337_v1, %v1339_v59  ;;  %v1359_v7 = vsel %vm78_vm0, %v1325_v2, %v1337_v1 }
 0x781   :  { %1283 = vmatpush1.msra.mxu1 %v1832_v55  ;;  %1417 = vmatpush1.msra.mxu0 %v1344_v63 }
 0x782   :  { %1418 = vmatprep.subr.mxu0 %v1342_v3  ;;  %1689 = vmatmul.mubr.msk.f32.vlgmr.msra.gmra.mxu1 %vm219_vm2, %v1235_v11  ;;  %v1511_v3 = vld [vmem:[%s2202_s4] sm:$0x7] }
 0x783   :  { %1419 = vmatpush1.msra.mxu0 %v1340_v4  ;;  %1583 = vmatprep.mubr.f32.mxu1 %v1904_v0 }
 0x784   :  { %1420 = vmatprep.subr.mxu0 %v1360_v5 }
 0x785   :  { %1421 = vmatpush1.msra.mxu0 %v1359_v7 }
 0x786   :  { %1692 = vmatmul.mubr.msk.f32.vlgmr.msra.gmra.mxu0 %vm65_vm1, %v1361_v6  ;;  %v1512_v6 = vld [vmem:[%s2204_s6] sm:$0x77] }
 0x787   :  { %1460 = vmatprep.mubr.f32.mxu0 %v1904_v0 }
 0x78a   :  { %1693 = vmatmul.mubr.msk.f32.gmra.mxu0 %vm65_vm1, %v1362_v8  ;;  %v1514_v8 = vcombine.high %v1512_v6, %v1512_v6 }
 0x78b   :  { %1466 = vmatprep.mubr.f32.mxu0 %v1904_v0 }
 0x78e   :  { %1694 = vmatmul.mubr.msk.f32.gmra.mxu0 %vm65_vm1, %v1363_v9 }
 0x78f   :  { %1472 = vmatprep.mubr.f32.mxu0 %v1904_v0 }
 0x792   :  { %1695 = vmatmul.mubr.msk.f32.gmra.mxu0 %vm65_vm1, %v1364_v10 }
 0x842   :  { %v1318_v5 = vpop.f32.mrf.mxu1 }
 0x844   :  { %v1320_v7 = vpop.f32.mrf.mxu1 }
 0x846   :  { %v1456_v12 = vpop.f32.mrf.mxu0 }
 0x847   :  { %v1457_v33 = vadd.f32 %v1456_v12, %v1366_v25 }
 0x848   :  { %v1458_v13 = vpop.f32.mrf.mxu0 }
 0x849   :  { %v1459_v0 = vadd.f32 %v1458_v13, %v1367_v21  ;;  %v1479_v44 = vmul.f32 %v1457_v33, %v1457_v33 }
 0x84a   :  { %v1462_v14 = vpop.f32.mrf.mxu0 }
 0x84b   :  { %v1463_v28 = vadd.f32 %v1462_v14, %v1368_v20  ;;  %v1480_v40 = vmul.f32 %v1459_v0, %v1459_v0  ;;  %v1487_v53 = vmul.f32 -12.5, %v1479_v44 }
 0x84c   :  { %v1464_v15 = vpop.f32.mrf.mxu0 }
 0x84d   :  { %v1465_v26 = vadd.f32 %v1464_v15, %v1369_v17  ;;  %v1481_v39 = vmul.f32 %v1463_v28, %v1463_v28  ;;  %v1488_v50 = vmul.f32 -12.5, %v1480_v40  ;;  %v1495_v58 = vmul.f32 1.442695, %v1487_v53 }
 0x84e   :  { %v1468_v18 = vpop.f32.mrf.mxu0  ;;  %v1239_v15 = vlaneseq }
 0x84f   :  { %v1469_v22 = vadd.f32 %v1468_v18, %v1370_v16  ;;  %v1482_v36 = vmul.f32 %v1465_v26, %v1465_v26  ;;  %v1489_v48 = vmul.f32 -12.5, %v1481_v39  ;;  %v1497_v57 = vmul.f32 1.442695, %v1488_v50 }
 0x850   :  { %v1470_v23 = vpop.f32.mrf.mxu0  ;;  %v1240_v17 = vshrl.u32 %v1239_v15, 7 }
 0x851   :  { %v1471_v27 = vadd.f32 %v1470_v23, %v1371_v19  ;;  %v1483_v34 = vmul.f32 %v1469_v22, %v1469_v22  ;;  %v1490_v46 = vmul.f32 -12.5, %v1482_v36  ;;  %v1499_v56 = vmul.f32 1.442695, %v1489_v48  ;;  %v1688_v23 = vld [vmem:[%s2204_s6 + $0x3] ss:$4 sm:$0x3] }
 0x852   :  { %v1474_v29 = vpop.f32.mrf.mxu0  ;;  %v1241_v21 = vsub.s32 0, %v1240_v17  ;;  %v1245_v22 = vsub.s32 1, %v1240_v17 }
 0x853   :  { %v1484_v31 = vmul.f32 %v1471_v27, %v1471_v27  ;;  %v1475_v32 = vadd.f32 %v1474_v29, %v1372_v24  ;;  %v1491_v45 = vmul.f32 -12.5, %v1483_v34  ;;  %v1501_v55 = vmul.f32 1.442695, %v1490_v46 }
 0x854   :  { %v1476_v35 = vpop.f32.mrf.mxu0  ;;  %v1242_v24 = vrot.slane %v1688_v23, %v1241_v21  ;;  %v1246_v25 = vrot.slane %v1688_v23, %v1245_v22 }
 0x855   :  { %v1485_v37 = vmul.f32 %v1475_v32, %v1475_v32  ;;  %v1477_v38 = vadd.f32 %v1476_v35, %v1373_v30  ;;  %v1492_v41 = vmul.f32 -12.5, %v1484_v31  ;;  %v1503_v54 = vmul.f32 1.442695, %v1491_v45 }
 0x856   :  { %v1319_v26 = vadd.f32 %v1318_v5, %v1242_v24  ;;  %v1321_v27 = vadd.f32 %v1320_v7, %v1246_v25 }
 0x857   :  { %v1493_v42 = vmul.f32 -12.5, %v1485_v37  ;;  %v1486_v43 = vmul.f32 %v1477_v38, %v1477_v38  ;;  %v1505_v51 = vmul.f32 1.442695, %v1492_v41 }
 0x858   :  { %v1604_v29 = vrot.slane %v1319_v26, 5  ;;  %v1605_v30 = vrot.slane %v1321_v27, 5 }
 0x859   :  { %v1494_v47 = vmul.f32 -12.5, %v1486_v43  ;;  %v1507_v49 = vmul.f32 1.442695, %v1493_v42 }
 0x85b   :  { %v1509_v52 = vmul.f32 1.442695, %v1494_v47 }
 0x85d   :  { %1833 = vpow2.f32 %v1509_v52 }
 0x85e   :  { %1835 = vpow2.f32 %v1507_v49 }
 0x85f   :  { %1837 = vpow2.f32 %v1505_v51 }
 0x860   :  { %1839 = vpow2.f32 %v1503_v54 }
 0x861   :  { %1841 = vpow2.f32 %v1501_v55 }
 0x862   :  { %1843 = vpow2.f32 %v1499_v56 }
 0x863   :  { %1845 = vpow2.f32 %v1497_v57 }
 0x864   :  { %1847 = vpow2.f32 %v1495_v58 }
 0x86a   :  { %v1834_v59 = vpop.eup %1833 }
 0x86b   :  { %v1836_v60 = vpop.eup %1835  ;;  %1543 = vmatprep.subr.mxu1 %v1834_v59 }
 0x86c   :  { %v1838_v61 = vpop.eup %1837  ;;  %1544 = vmatpush1.msra.mxu1 %v1836_v60 }
 0x86d   :  { %v1840_v62 = vpop.eup %1839  ;;  %1545 = vmatprep.subr.mxu1 %v1838_v61 }
 0x86e   :  { %v1842_v63 = vpop.eup %1841  ;;  %1546 = vmatpush1.msra.mxu1 %v1840_v62 }
 0x86f   :  { %v1844_v1 = vpop.eup %1843  ;;  %1547 = vmatprep.subr.mxu1 %v1842_v63 }
 0x870   :  { %v1846_v2 = vpop.eup %1845  ;;  %1548 = vmatpush1.msra.mxu1 %v1844_v1 }
 0x871   :  { %v1848_v4 = vpop.eup %1847  ;;  %1549 = vmatprep.subr.mxu1 %v1846_v2 }
 0x872   :  { %1550 = vmatpush1.msra.mxu1 %v1848_v4 }
 0x873   :  { %1696 = vmatmul.mubr.msk.f32.vlgmr.msra.gmra.mxu1 %vm219_vm2, %v1511_v3 }
 0x933   :  { %v1585_v9 = vpop.f32.mrf.mxu1 }
 0x934   :  { %v1586_v10 = vadd.f32 %v1585_v9, %v1512_v6 }
 0x935   :  { %v1587_v11 = vpop.f32.mrf.mxu1 }
 0x936   :  { %v1697_v12 = vmul.f32 -1.442695, %v1586_v10  ;;  %v1588_v13 = vadd.f32 %v1587_v11, %v1514_v8 }
 0x938   :  { %1849 = vpow2.f32 %v1697_v12  ;;  %v1698_v14 = vmul.f32 -1.442695, %v1588_v13 }
 0x93a   :  { %1851 = vpow2.f32 %v1698_v14 }
 0x945   :  { %v1850_v16 = vpop.eup %1849 }
 0x946   :  { %v1596_v18 = vadd.f32 1.0, %v1850_v16 }
 0x947   :  { %v1852_v19 = vpop.eup %1851 }
 0x948   :  { %1853 = vrcp.f32 %v1596_v18  ;;  %v1597_v20 = vadd.f32 1.0, %v1852_v19 }
 0x94a   :  { %1855 = vrcp.f32 %v1597_v20 }
 0x955   :  { %v1854_v28 = vpop.eup %1853 }
 0x956   :  { %v1608_v31 = vsel %vm78_vm0, %v1854_v28, %v1604_v29 }
 0x957   :  { %v1856_v0 = vpop.eup %1855 }
 0x958   :  { %v1609_v32 = vsel %vm78_vm0, %v1856_v0, %v1605_v30 }
 0x959   :  { %v1612_v33 = vcombine.low %v1608_v31, %v1609_v32 }
 0x95b   :  { %1614 = vst [vmem:[#allocation5] sm:$0xff] %v1612_v33 }
 0x95c   :  { %1888 = shalt.err (!%p1885_p9)
}
 0x95d   :  { %1624 = dma.vmem_to_hbm [thread:$0]  %s1622_s10, 128, %s2205_s7, [#allocation4]  }
 0x95e   :  { %1899 = dma.done.wait [#allocation4], 128  }
 0x95f   :  { %1900 = vsyncadd [#allocation4], 4294967168 }
 0x960   :  { %1628 = vsyncpa [#allocation3], 1 }
 0x961   :  { %1629 = vsyncpa [#allocation4], 1 }

</bundles_post_ra>
